<compile_context>
chip_gen: v7x
topology: tpu7x:2x2x1
jax: 0.10.0
libtpu: 0.0.40
codegen_flags: <defaults>
</compile_context>

<pallas_src>
import functools
import math

import jax
import jax.numpy as jnp
from jax import lax
from jax.experimental import pallas as pl
from jax.experimental.pallas import tpu as pltpu

EPS = 1e-5        # nn.BatchNorm2d default eps
SLOPE = 0.2       # LeakyReLU negative slope
K = 5             # conv kernel size
S = 2             # conv stride
LANE = 128        # lane width / MXU N alignment
SUBLANE = 16      # sublane rounding (bf16-native tile is (16, 128))
TM_MAX = 512      # max M-tile rows
MIB = 1024 * 1024


def _round_up(x, m):
    return (x + m - 1) // m * m


def _cdiv(a, b):
    return (a + b - 1) // b


# ---------------------------------------------------------------------------
# Pallas kernels
# ---------------------------------------------------------------------------
def _conv_bn_lrelu_kernel(p_ref, w_ref, g_ref, b_ref, o_ref,
                          y_sc, sum_sc, sq_sc, *, inv_m):
    """Fused conv(im2col-matmul) + training-mode BatchNorm + LeakyReLU(0.2).

    Grid is "arbitrary" over M.  y (f32) stays resident in VMEM scratch; the
    activated bf16 output (resident block) is written once at the last step.
    """
    i = pl.program_id(0)

    @pl.when(i == 0)
    def _init():
        sum_sc[...] = jnp.zeros_like(sum_sc)
        sq_sc[...] = jnp.zeros_like(sq_sc)

    y = jnp.dot(p_ref[...], w_ref[...], preferred_element_type=jnp.float32)
    tm, ocp = y.shape
    row0 = pl.multiple_of(i * tm, tm)
    y_sc[pl.ds(row0, tm), :] = y

    # (8, OCp) partial sums: cross-vreg VPU adds per step; zero-padded rows
    # contribute exactly 0.  The 8->1 sublane (XLU) reduction runs only once.
    yg = y.reshape(tm // 8, 8, ocp)
    sum_sc[...] += jnp.sum(yg, axis=0)
    sq_sc[...] += jnp.sum(yg * yg, axis=0)

    @pl.when(i == pl.num_programs(0) - 1)
    def _finalize():
        s = jnp.sum(sum_sc[...], axis=0, keepdims=True)
        ss = jnp.sum(sq_sc[...], axis=0, keepdims=True)
        mean = s * inv_m
        var = jnp.maximum(ss * inv_m - mean * mean, 0.0)   # biased (training) var
        scale = g_ref[...] * lax.rsqrt(var + EPS)
        shift = b_ref[...] - mean * scale
        z = y_sc[...] * scale + shift
        o_ref[...] = jnp.where(z > 0, z, SLOPE * z).astype(o_ref.dtype)


def _matmul_tanh_kernel(p_ref, w_ref, o_ref):
    """Final layer: y = patches @ W ; tanh."""
    y = jnp.dot(p_ref[...], w_ref[...], preferred_element_type=jnp.float32)
    o_ref[...] = jnp.tanh(y)


# ---------------------------------------------------------------------------
# pallas_call wrappers
# ---------------------------------------------------------------------------
def _vmem_limit(footprint_bytes):
    # Size from the actual footprint; cap at 48 MiB (v7x has 64 MiB physical).
    return int(min(max(2 * footprint_bytes, 8 * MIB), 48 * MIB))


def _conv_bn_lrelu(p_pad, w_mat, gamma_p, beta_p, m_true, tm):
    m_pad, kp = p_pad.shape
    ocp = w_mat.shape[1]
    grid = (m_pad // tm,)

    # resident y (f32) + resident bf16 output + double-buffered patch tile
    # + resident weights + stats scratch
    footprint = (m_pad * ocp * 4 + m_pad * ocp * 2 + 2 * tm * kp * 2
                 + kp * ocp * 2 + 16 * ocp * 4)
    # TODO(synk): for very large M / K (big ndf or batch) fall back to a
    # two-pass structure with a K grid axis instead of a resident y scratch.
    assert footprint < 40 * MIB, "activation too large for fused BN path"

    return pl.pallas_call(
        functools.partial(_conv_bn_lrelu_kernel, inv_m=1.0 / m_true),
        grid=grid,
        in_specs=[
            pl.BlockSpec((tm, kp), lambda i: (i, 0)),      # patches tile
            pl.BlockSpec((kp, ocp), lambda i: (0, 0)),     # weights (resident)
            pl.BlockSpec((1, ocp), lambda i: (0, 0)),      # gamma
            pl.BlockSpec((1, ocp), lambda i: (0, 0)),      # beta
        ],
        out_specs=pl.BlockSpec((m_pad, ocp), lambda i: (0, 0)),  # resident out
        out_shape=jax.ShapeDtypeStruct((m_pad, ocp), jnp.bfloat16),
        scratch_shapes=[pltpu.VMEM((m_pad, ocp), jnp.float32),   # y
                        pltpu.VMEM((8, ocp), jnp.float32),       # sum
                        pltpu.VMEM((8, ocp), jnp.float32)],      # sum of squares
        compiler_params=pltpu.CompilerParams(
            # stats accumulate sequentially across M -> must stay "arbitrary"
            dimension_semantics=("arbitrary",),
            vmem_limit_bytes=_vmem_limit(footprint)),
    )(p_pad, w_mat, gamma_p, beta_p)


def _conv_tanh(p_pad, w_mat, tm):
    m_pad, kp = p_pad.shape
    ocp = w_mat.shape[1]
    grid = (m_pad // tm,)
    footprint = 2 * (tm * kp * 2 + tm * ocp * 4) + kp * ocp * 2
    return pl.pallas_call(
        _matmul_tanh_kernel,
        grid=grid,
        in_specs=[
            pl.BlockSpec((tm, kp), lambda i: (i, 0)),
            pl.BlockSpec((kp, ocp), lambda i: (0, 0)),
        ],
        out_specs=pl.BlockSpec((tm, ocp), lambda i: (i, 0)),
        out_shape=jax.ShapeDtypeStruct((m_pad, ocp), jnp.float32),
        compiler_params=pltpu.CompilerParams(
            dimension_semantics=("parallel",),     # megacore-shardable on v7x
            vmem_limit_bytes=_vmem_limit(footprint)),
    )(p_pad, w_mat)


# ---------------------------------------------------------------------------
# Glue: im2col for 5x5 / stride-2 / no-padding conv (NHWC, bf16)
# ---------------------------------------------------------------------------
def _im2col(x_nhwc):
    """Patches as one fused gather. Rows: (n, oh, ow); columns: (C, KH, KW)."""
    n, h, w, c = x_nhwc.shape
    oh = (h - K) // S + 1
    ow = (w - K) // S + 1
    p = lax.conv_general_dilated_patches(
        x_nhwc, filter_shape=(K, K), window_strides=(S, S), padding="VALID",
        dimension_numbers=("NHWC", "HWIO", "NHWC"))
    # TODO(synk): build patches inside the matmul kernel (strided pl.ds loads
    # from a VMEM-resident NHWC tile) and fuse the whole 3-layer pyramid into
    # one pallas_call; at these activation sizes that removes all inter-layer
    # HBM glue and the 25x patch read amplification.
    return p.reshape(n * oh * ow, c * K * K), oh, ow


# ---------------------------------------------------------------------------
# Parameter construction (mirrors Encoder.__init__ layer-shape logic)
# ---------------------------------------------------------------------------
def init_params(key, isize, nc, ndf):
    cfgs = [(nc, ndf, True)]                       # (in_c, out_c, has_bn)
    csize = math.floor((isize - K) / S + 1)
    cndf = ndf
    out_feat = None
    while csize > 5:
        out_feat = cndf * 2
        cfgs.append((cndf, out_feat, True))
        cndf = out_feat
        csize = math.floor((csize - K) / S + 1)
    assert out_feat is not None, "isize too small: pyramid loop must run >= once"
    cfgs.append((out_feat, out_feat * 2, False))   # final conv + tanh

    layers = []
    for (ic, oc, bn) in cfgs:
        key, kw_, kg, kb = jax.random.split(key, 4)
        fan_in = ic * K * K
        kdim = ic * K * K
        kp = _round_up(kdim, LANE)
        ocp = _round_up(oc, LANE)
        w = jax.random.normal(kw_, (oc, ic, K, K), jnp.float32) / math.sqrt(fan_in)
        # (OC,IC,KH,KW) -> (IC,KH,KW,OC) -> (IC*KH*KW, OC): matches patch order
        w_mat = jnp.transpose(w, (1, 2, 3, 0)).reshape(kdim, oc)
        w_mat = jnp.pad(w_mat, ((0, kp - kdim), (0, ocp - oc))).astype(jnp.bfloat16)
        layer = {"w_mat": w_mat, "w_oihw": w, "bn": bn, "oc": oc}
        if bn:
            gamma = 1.0 + 0.1 * jax.random.normal(kg, (oc,), jnp.float32)
            beta = 0.1 * jax.random.normal(kb, (oc,), jnp.float32)
            layer["gamma"] = gamma
            layer["beta"] = beta
            layer["gamma_p"] = jnp.concatenate(
                [gamma, jnp.ones((ocp - oc,), jnp.float32)]).reshape(1, ocp)
            layer["beta_p"] = jnp.concatenate(
                [beta, jnp.zeros((ocp - oc,), jnp.float32)]).reshape(1, ocp)
        layers.append(layer)
    return layers


# ---------------------------------------------------------------------------
# Forward (training-mode BN == PyTorch default right after __init__)
# ---------------------------------------------------------------------------
def encoder_forward(x_nchw, layers):
    # NCHW -> NHWC; cast to bf16 BEFORE im2col so patch matrices are bf16.
    x = jnp.transpose(x_nchw, (0, 2, 3, 1)).astype(jnp.bfloat16)
    for layer in layers:
        n = x.shape[0]
        p, oh, ow = _im2col(x)
        m, kdim = p.shape
        kp = layer["w_mat"].shape[0]
        # balanced M tiles: avoid padding to a full TM_MAX multiple
        ntiles = max(1, _cdiv(m, TM_MAX))
        tm = _round_up(_cdiv(m, ntiles), SUBLANE)
        m_pad = ntiles * tm
        p_pad = jnp.pad(p, ((0, m_pad - m), (0, kp - kdim)))
        if layer["bn"]:
            y = _conv_bn_lrelu(p_pad, layer["w_mat"], layer["gamma_p"],
                               layer["beta_p"], m, tm)
        else:
            y = _conv_tanh(p_pad, layer["w_mat"], tm)
        x = y[:m, :layer["oc"]].reshape(n, oh, ow, layer["oc"])
    return jnp.transpose(x.astype(jnp.float32), (0, 3, 1, 2))   # back to NCHW


# ---------------------------------------------------------------------------
# Pure-JAX f32 reference (exact PyTorch forward semantics) for validation
# ---------------------------------------------------------------------------
def encoder_reference(x_nchw, layers):
    x = x_nchw.astype(jnp.float32)
    for layer in layers:
        x = lax.conv_general_dilated(
            x, layer["w_oihw"], window_strides=(S, S), padding="VALID",
            dimension_numbers=("NCHW", "OIHW", "NCHW"),
            precision=lax.Precision.HIGHEST)
        if layer["bn"]:
            mean = jnp.mean(x, axis=(0, 2, 3), keepdims=True)
            var = jnp.mean((x - mean) ** 2, axis=(0, 2, 3), keepdims=True)
            xn = (x - mean) * lax.rsqrt(var + EPS)
            xn = xn * layer["gamma"].reshape(1, -1, 1, 1) \
                 + layer["beta"].reshape(1, -1, 1, 1)
            x = jnp.where(xn > 0, xn, SLOPE * xn)
        else:
            x = jnp.tanh(x)
    return x


if __name__ == "__main__":
    # isize=29, nc=3, ndf=8  =>  spatial 29 -> 13 -> 5 -> 1, channels 3->8->16->32
    isize, nc, ndf, batch = 29, 3, 8, 2
    key = jax.random.PRNGKey(0)
    kx, kparam = jax.random.split(key)
    x = jax.random.normal(kx, (batch, nc, isize, isize), jnp.float32)
    params = init_params(kparam, isize, nc, ndf)

    fwd = jax.jit(lambda inp: encoder_forward(inp, params))
    out = jax.block_until_ready(fwd(x))

    assert out.shape == (batch, 4 * ndf, 1, 1), out.shape
    assert bool(jnp.all(jnp.isfinite(out)))

    ref = jax.block_until_ready(encoder_reference(x, params))
    max_err = float(jnp.max(jnp.abs(out - ref)))
    # bf16 MXU operands / bf16 inter-layer activations with f32 accumulation
    # and f32 BN statistics -> small numerical drift expected
    assert max_err < 0.1, f"max |kernel - f32 reference| = {max_err}"
    print("KERNEL_OK")
</pallas_src>

<mosaic_0001>
module attributes {stable_mosaic.version = 11 : i64} {
  func.func @_conv_bn_lrelu_kernel(%arg0: i32, %arg1: memref<352x128xbf16, #tpu.memory_space<vmem>>, %arg2: memref<128x128xbf16, #tpu.memory_space<vmem>>, %arg3: memref<1x128xf32, #tpu.memory_space<vmem>>, %arg4: memref<1x128xf32, #tpu.memory_space<vmem>>, %arg5: memref<352x128xbf16, #tpu.memory_space<vmem>>, %arg6: memref<352x128xf32, #tpu.memory_space<vmem>>, %arg7: memref<8x128xf32, #tpu.memory_space<vmem>>, %arg8: memref<8x128xf32, #tpu.memory_space<vmem>>) attributes {dimension_semantics = [#tpu.dimension_semantics<arbitrary>], iteration_bounds = array<i64: 1>, scalar_prefetch = 0 : i64, scratch_operands = 3 : i64, tpu.core_type = #tpu.core_type<tc>, window_params = [{transform_indices = @transform_0, window_bounds = array<i64: 352, 128>}, {pipeline_mode = #tpu.pipeline_mode<synchronous>, transform_indices = @transform_1, window_bounds = array<i64: 128, 128>}, {pipeline_mode = #tpu.pipeline_mode<synchronous>, transform_indices = @transform_2, window_bounds = array<i64: 1, 128>}, {pipeline_mode = #tpu.pipeline_mode<synchronous>, transform_indices = @transform_3, window_bounds = array<i64: 1, 128>}, {pipeline_mode = #tpu.pipeline_mode<synchronous>, transform_indices = @transform_4, window_bounds = array<i64: 352, 128>}]} {
    %c0_i32 = arith.constant 0 : i32
    %0 = arith.cmpi eq, %arg0, %c0_i32 : i32
    %1 = arith.extui %0 : i1 to i32
    %c0_i32_0 = arith.constant 0 : i32
    %2 = arith.cmpi ne, %1, %c0_i32_0 : i32
    scf.if %2 {
      %cst_17 = arith.constant 0.000000e+00 : f32
      %23 = vector.broadcast %cst_17 : f32 to vector<8x128xf32>
      %c0_18 = arith.constant 0 : index
      %c0_19 = arith.constant 0 : index
      %24 = vector.load %arg7[%c0_18, %c0_19] : memref<8x128xf32, #tpu.memory_space<vmem>>, vector<8x128xf32>
      tpu.vector_store %arg7[%c0_18, %c0_19], %23 {strides = array<i32>} : memref<8x128xf32, #tpu.memory_space<vmem>>, vector<8x128xf32>,
      %cst_20 = arith.constant 0.000000e+00 : f32
      %25 = vector.broadcast %cst_20 : f32 to vector<8x128xf32>
      %c0_21 = arith.constant 0 : index
      %c0_22 = arith.constant 0 : index
      %26 = vector.load %arg8[%c0_21, %c0_22] : memref<8x128xf32, #tpu.memory_space<vmem>>, vector<8x128xf32>
      tpu.vector_store %arg8[%c0_21, %c0_22], %25 {strides = array<i32>} : memref<8x128xf32, #tpu.memory_space<vmem>>, vector<8x128xf32>,
    } else {
    }
    %c0 = arith.constant 0 : index
    %c0_1 = arith.constant 0 : index
    %3 = vector.load %arg1[%c0, %c0_1] : memref<352x128xbf16, #tpu.memory_space<vmem>>, vector<352x128xbf16>
    %c0_2 = arith.constant 0 : index
    %c0_3 = arith.constant 0 : index
    %4 = vector.load %arg2[%c0_2, %c0_3] : memref<128x128xbf16, #tpu.memory_space<vmem>>, vector<128x128xbf16>
    %cst = arith.constant dense<0.000000e+00> : vector<352x128xf32>
    %5 = tpu.matmul %3, %4, %cst {dimension_numbers = #tpu.dot_dimension_numbers<[1], [0], [0], [1], [0, 0, 1, 1], [], []>} : vector<352x128xbf16>, vector<128x128xbf16>, vector<352x128xf32> -> vector<352x128xf32>
    %c352_i32 = arith.constant 352 : i32
    %6 = arith.muli %arg0, %c352_i32 : i32
    %7 = tpu.assume_multiple %6, 352 : i32
    %8 = arith.index_cast %7 : i32 to index
    %c0_4 = arith.constant 0 : index
    %9 = vector.load %arg6[%8, %c0_4] : memref<352x128xf32, #tpu.memory_space<vmem>>, vector<352x128xf32>
    tpu.vector_store %arg6[%8, %c0_4], %5 {strides = array<i32>} : memref<352x128xf32, #tpu.memory_space<vmem>>, vector<352x128xf32>,
    %10 = vector.shape_cast %5 : vector<352x128xf32> to vector<44x8x128xf32>
    %c0_5 = arith.constant 0 : index
    %c0_6 = arith.constant 0 : index
    %11 = vector.load %arg7[%c0_5, %c0_6] : memref<8x128xf32, #tpu.memory_space<vmem>>, vector<8x128xf32>
    %cst_7 = arith.constant dense<0.000000e+00> : vector<8x128xf32>
    %12 = vector.multi_reduction <add>, %10, %cst_7 [0] : vector<44x8x128xf32> to vector<8x128xf32>
    %13 = arith.addf %11, %12 : vector<8x128xf32>
    %c0_8 = arith.constant 0 : index
    %c0_9 = arith.constant 0 : index
    %14 = vector.load %arg7[%c0_8, %c0_9] : memref<8x128xf32, #tpu.memory_space<vmem>>, vector<8x128xf32>
    tpu.vector_store %arg7[%c0_8, %c0_9], %13 {strides = array<i32>} : memref<8x128xf32, #tpu.memory_space<vmem>>, vector<8x128xf32>,
    %c0_10 = arith.constant 0 : index
    %c0_11 = arith.constant 0 : index
    %15 = vector.load %arg8[%c0_10, %c0_11] : memref<8x128xf32, #tpu.memory_space<vmem>>, vector<8x128xf32>
    %16 = arith.mulf %10, %10 : vector<44x8x128xf32>
    %cst_12 = arith.constant dense<0.000000e+00> : vector<8x128xf32>
    %17 = vector.multi_reduction <add>, %16, %cst_12 [0] : vector<44x8x128xf32> to vector<8x128xf32>
    %18 = arith.addf %15, %17 : vector<8x128xf32>
    %c0_13 = arith.constant 0 : index
    %c0_14 = arith.constant 0 : index
    %19 = vector.load %arg8[%c0_13, %c0_14] : memref<8x128xf32, #tpu.memory_space<vmem>>, vector<8x128xf32>
    tpu.vector_store %arg8[%c0_13, %c0_14], %18 {strides = array<i32>} : memref<8x128xf32, #tpu.memory_space<vmem>>, vector<8x128xf32>,
    %c0_i32_15 = arith.constant 0 : i32
    %20 = arith.cmpi eq, %arg0, %c0_i32_15 : i32
    %21 = arith.extui %20 : i1 to i32
    %c0_i32_16 = arith.constant 0 : i32
    %22 = arith.cmpi ne, %21, %c0_i32_16 : i32
    scf.if %22 {
      %c0_17 = arith.constant 0 : index
      %c0_18 = arith.constant 0 : index
      %23 = vector.load %arg7[%c0_17, %c0_18] : memref<8x128xf32, #tpu.memory_space<vmem>>, vector<8x128xf32>
      %cst_19 = arith.constant dense<0.000000e+00> : vector<128xf32>
      %24 = vector.multi_reduction <add>, %23, %cst_19 [0] : vector<8x128xf32> to vector<128xf32>
      %25 = vector.shape_cast %24 : vector<128xf32> to vector<1x128xf32>
      %c0_20 = arith.constant 0 : index
      %c0_21 = arith.constant 0 : index
      %26 = vector.load %arg8[%c0_20, %c0_21] : memref<8x128xf32, #tpu.memory_space<vmem>>, vector<8x128xf32>
      %cst_22 = arith.constant dense<0.000000e+00> : vector<128xf32>
      %27 = vector.multi_reduction <add>, %26, %cst_22 [0] : vector<8x128xf32> to vector<128xf32>
      %28 = vector.shape_cast %27 : vector<128xf32> to vector<1x128xf32>
      %cst_23 = arith.constant 2.958580e-03 : f32
      %29 = vector.broadcast %cst_23 : f32 to vector<1x128xf32>
      %30 = arith.mulf %25, %29 : vector<1x128xf32>
      %cst_24 = arith.constant 2.958580e-03 : f32
      %31 = vector.broadcast %cst_24 : f32 to vector<1x128xf32>
      %32 = arith.mulf %28, %31 : vector<1x128xf32>
      %33 = arith.mulf %30, %30 : vector<1x128xf32>
      %34 = arith.subf %32, %33 : vector<1x128xf32>
      %cst_25 = arith.constant 0.000000e+00 : f32
      %35 = vector.broadcast %cst_25 : f32 to vector<1x128xf32>
      %36 = arith.maximumf %34, %35 : vector<1x128xf32>
      %c0_26 = arith.constant 0 : index
      %c0_27 = arith.constant 0 : index
      %37 = vector.load %arg3[%c0_26, %c0_27] : memref<1x128xf32, #tpu.memory_space<vmem>>, vector<1x128xf32>
      %cst_28 = arith.constant 9.99999974E-6 : f32
      %38 = vector.broadcast %cst_28 : f32 to vector<1x128xf32>
      %39 = arith.addf %36, %38 : vector<1x128xf32>
      %40 = math.rsqrt %39 : vector<1x128xf32>
      %41 = arith.mulf %37, %40 : vector<1x128xf32>
      %c0_29 = arith.constant 0 : index
      %c0_30 = arith.constant 0 : index
      %42 = vector.load %arg4[%c0_29, %c0_30] : memref<1x128xf32, #tpu.memory_space<vmem>>, vector<1x128xf32>
      %43 = arith.mulf %30, %41 : vector<1x128xf32>
      %44 = arith.subf %42, %43 : vector<1x128xf32>
      %c0_31 = arith.constant 0 : index
      %c0_32 = arith.constant 0 : index
      %45 = vector.load %arg6[%c0_31, %c0_32] : memref<352x128xf32, #tpu.memory_space<vmem>>, vector<352x128xf32>
      %46 = vector.broadcast %41 : vector<1x128xf32> to vector<352x128xf32>
      %47 = arith.mulf %45, %46 : vector<352x128xf32>
      %48 = vector.broadcast %44 : vector<1x128xf32> to vector<352x128xf32>
      %49 = arith.addf %47, %48 : vector<352x128xf32>
      %cst_33 = arith.constant 0.000000e+00 : f32
      %50 = vector.broadcast %cst_33 : f32 to vector<352x128xf32>
      %51 = arith.cmpf ogt, %49, %50 : vector<352x128xf32>
      %cst_34 = arith.constant 2.000000e-01 : f32
      %52 = vector.broadcast %cst_34 : f32 to vector<352x128xf32>
      %53 = arith.mulf %52, %49 : vector<352x128xf32>
      %54 = arith.select %51, %49, %53 : vector<352x128xi1>, vector<352x128xf32>
      %55 = arith.truncf %54 : vector<352x128xf32> to vector<352x128xbf16>
      %c0_35 = arith.constant 0 : index
      %c0_36 = arith.constant 0 : index
      %56 = vector.load %arg5[%c0_35, %c0_36] : memref<352x128xbf16, #tpu.memory_space<vmem>>, vector<352x128xbf16>
      tpu.vector_store %arg5[%c0_35, %c0_36], %55 {strides = array<i32>} : memref<352x128xbf16, #tpu.memory_space<vmem>>, vector<352x128xbf16>,
    } else {
    }
    return
  }
  func.func @transform_0(%arg0: i32) -> (i32, i32) {
    %c0_i32 = arith.constant 0 : i32
    %c0_i32_0 = arith.constant 0 : i32
    return %arg0, %c0_i32 : i32, i32
  }
  func.func @transform_1(%arg0: i32) -> (i32, i32) {
    %c0_i32 = arith.constant 0 : i32
    %c0_i32_0 = arith.constant 0 : i32
    %c0_i32_1 = arith.constant 0 : i32
    return %c0_i32, %c0_i32_0 : i32, i32
  }
  func.func @transform_2(%arg0: i32) -> (i32, i32) {
    %c0_i32 = arith.constant 0 : i32
    %c0_i32_0 = arith.constant 0 : i32
    %c0_i32_1 = arith.constant 0 : i32
    return %c0_i32, %c0_i32_0 : i32, i32
  }
  func.func @transform_3(%arg0: i32) -> (i32, i32) {
    %c0_i32 = arith.constant 0 : i32
    %c0_i32_0 = arith.constant 0 : i32
    %c0_i32_1 = arith.constant 0 : i32
    return %c0_i32, %c0_i32_0 : i32, i32
  }
  func.func @transform_4(%arg0: i32) -> (i32, i32) {
    %c0_i32 = arith.constant 0 : i32
    %c0_i32_0 = arith.constant 0 : i32
    %c0_i32_1 = arith.constant 0 : i32
    return %c0_i32, %c0_i32_0 : i32, i32
  }
}

module attributes {stable_mosaic.version = 11 : i64} {
  func.func @_conv_bn_lrelu_kernel(%arg0: i32, %arg1: memref<64x256xbf16, #tpu.memory_space<vmem>>, %arg2: memref<256x128xbf16, #tpu.memory_space<vmem>>, %arg3: memref<1x128xf32, #tpu.memory_space<vmem>>, %arg4: memref<1x128xf32, #tpu.memory_space<vmem>>, %arg5: memref<64x128xbf16, #tpu.memory_space<vmem>>, %arg6: memref<64x128xf32, #tpu.memory_space<vmem>>, %arg7: memref<8x128xf32, #tpu.memory_space<vmem>>, %arg8: memref<8x128xf32, #tpu.memory_space<vmem>>) attributes {dimension_semantics = [#tpu.dimension_semantics<arbitrary>], iteration_bounds = array<i64: 1>, scalar_prefetch = 0 : i64, scratch_operands = 3 : i64, tpu.core_type = #tpu.core_type<tc>, window_params = [{transform_indices = @transform_0, window_bounds = array<i64: 64, 256>}, {pipeline_mode = #tpu.pipeline_mode<synchronous>, transform_indices = @transform_1, window_bounds = array<i64: 256, 128>}, {pipeline_mode = #tpu.pipeline_mode<synchronous>, transform_indices = @transform_2, window_bounds = array<i64: 1, 128>}, {pipeline_mode = #tpu.pipeline_mode<synchronous>, transform_indices = @transform_3, window_bounds = array<i64: 1, 128>}, {pipeline_mode = #tpu.pipeline_mode<synchronous>, transform_indices = @transform_4, window_bounds = array<i64: 64, 128>}]} {
    %c0_i32 = arith.constant 0 : i32
    %0 = arith.cmpi eq, %arg0, %c0_i32 : i32
    %1 = arith.extui %0 : i1 to i32
    %c0_i32_0 = arith.constant 0 : i32
    %2 = arith.cmpi ne, %1, %c0_i32_0 : i32
    scf.if %2 {
      %cst_17 = arith.constant 0.000000e+00 : f32
      %23 = vector.broadcast %cst_17 : f32 to vector<8x128xf32>
      %c0_18 = arith.constant 0 : index
      %c0_19 = arith.constant 0 : index
      %24 = vector.load %arg7[%c0_18, %c0_19] : memref<8x128xf32, #tpu.memory_space<vmem>>, vector<8x128xf32>
      tpu.vector_store %arg7[%c0_18, %c0_19], %23 {strides = array<i32>} : memref<8x128xf32, #tpu.memory_space<vmem>>, vector<8x128xf32>,
      %cst_20 = arith.constant 0.000000e+00 : f32
      %25 = vector.broadcast %cst_20 : f32 to vector<8x128xf32>
      %c0_21 = arith.constant 0 : index
      %c0_22 = arith.constant 0 : index
      %26 = vector.load %arg8[%c0_21, %c0_22] : memref<8x128xf32, #tpu.memory_space<vmem>>, vector<8x128xf32>
      tpu.vector_store %arg8[%c0_21, %c0_22], %25 {strides = array<i32>} : memref<8x128xf32, #tpu.memory_space<vmem>>, vector<8x128xf32>,
    } else {
    }
    %c0 = arith.constant 0 : index
    %c0_1 = arith.constant 0 : index
    %3 = vector.load %arg1[%c0, %c0_1] : memref<64x256xbf16, #tpu.memory_space<vmem>>, vector<64x256xbf16>
    %c0_2 = arith.constant 0 : index
    %c0_3 = arith.constant 0 : index
    %4 = vector.load %arg2[%c0_2, %c0_3] : memref<256x128xbf16, #tpu.memory_space<vmem>>, vector<256x128xbf16>
    %cst = arith.constant dense<0.000000e+00> : vector<64x128xf32>
    %5 = tpu.matmul %3, %4, %cst {dimension_numbers = #tpu.dot_dimension_numbers<[1], [0], [0], [1], [0, 0, 1, 1], [], []>} : vector<64x256xbf16>, vector<256x128xbf16>, vector<64x128xf32> -> vector<64x128xf32>
    %c64_i32 = arith.constant 64 : i32
    %6 = arith.muli %arg0, %c64_i32 : i32
    %7 = tpu.assume_multiple %6, 64 : i32
    %8 = arith.index_cast %7 : i32 to index
    %c0_4 = arith.constant 0 : index
    %9 = vector.load %arg6[%8, %c0_4] : memref<64x128xf32, #tpu.memory_space<vmem>>, vector<64x128xf32>
    tpu.vector_store %arg6[%8, %c0_4], %5 {strides = array<i32>} : memref<64x128xf32, #tpu.memory_space<vmem>>, vector<64x128xf32>,
    %10 = vector.shape_cast %5 : vector<64x128xf32> to vector<8x8x128xf32>
    %c0_5 = arith.constant 0 : index
    %c0_6 = arith.constant 0 : index
    %11 = vector.load %arg7[%c0_5, %c0_6] : memref<8x128xf32, #tpu.memory_space<vmem>>, vector<8x128xf32>
    %cst_7 = arith.constant dense<0.000000e+00> : vector<8x128xf32>
    %12 = vector.multi_reduction <add>, %10, %cst_7 [0] : vector<8x8x128xf32> to vector<8x128xf32>
    %13 = arith.addf %11, %12 : vector<8x128xf32>
    %c0_8 = arith.constant 0 : index
    %c0_9 = arith.constant 0 : index
    %14 = vector.load %arg7[%c0_8, %c0_9] : memref<8x128xf32, #tpu.memory_space<vmem>>, vector<8x128xf32>
    tpu.vector_store %arg7[%c0_8, %c0_9], %13 {strides = array<i32>} : memref<8x128xf32, #tpu.memory_space<vmem>>, vector<8x128xf32>,
    %c0_10 = arith.constant 0 : index
    %c0_11 = arith.constant 0 : index
    %15 = vector.load %arg8[%c0_10, %c0_11] : memref<8x128xf32, #tpu.memory_space<vmem>>, vector<8x128xf32>
    %16 = arith.mulf %10, %10 : vector<8x8x128xf32>
    %cst_12 = arith.constant dense<0.000000e+00> : vector<8x128xf32>
    %17 = vector.multi_reduction <add>, %16, %cst_12 [0] : vector<8x8x128xf32> to vector<8x128xf32>
    %18 = arith.addf %15, %17 : vector<8x128xf32>
    %c0_13 = arith.constant 0 : index
    %c0_14 = arith.constant 0 : index
    %19 = vector.load %arg8[%c0_13, %c0_14] : memref<8x128xf32, #tpu.memory_space<vmem>>, vector<8x128xf32>
    tpu.vector_store %arg8[%c0_13, %c0_14], %18 {strides = array<i32>} : memref<8x128xf32, #tpu.memory_space<vmem>>, vector<8x128xf32>,
    %c0_i32_15 = arith.constant 0 : i32
    %20 = arith.cmpi eq, %arg0, %c0_i32_15 : i32
    %21 = arith.extui %20 : i1 to i32
    %c0_i32_16 = arith.constant 0 : i32
    %22 = arith.cmpi ne, %21, %c0_i32_16 : i32
    scf.if %22 {
      %c0_17 = arith.constant 0 : index
      %c0_18 = arith.constant 0 : index
      %23 = vector.load %arg7[%c0_17, %c0_18] : memref<8x128xf32, #tpu.memory_space<vmem>>, vector<8x128xf32>
      %cst_19 = arith.constant dense<0.000000e+00> : vector<128xf32>
      %24 = vector.multi_reduction <add>, %23, %cst_19 [0] : vector<8x128xf32> to vector<128xf32>
      %25 = vector.shape_cast %24 : vector<128xf32> to vector<1x128xf32>
      %c0_20 = arith.constant 0 : index
      %c0_21 = arith.constant 0 : index
      %26 = vector.load %arg8[%c0_20, %c0_21] : memref<8x128xf32, #tpu.memory_space<vmem>>, vector<8x128xf32>
      %cst_22 = arith.constant dense<0.000000e+00> : vector<128xf32>
      %27 = vector.multi_reduction <add>, %26, %cst_22 [0] : vector<8x128xf32> to vector<128xf32>
      %28 = vector.shape_cast %27 : vector<128xf32> to vector<1x128xf32>
      %cst_23 = arith.constant 2.000000e-02 : f32
      %29 = vector.broadcast %cst_23 : f32 to vector<1x128xf32>
      %30 = arith.mulf %25, %29 : vector<1x128xf32>
      %cst_24 = arith.constant 2.000000e-02 : f32
      %31 = vector.broadcast %cst_24 : f32 to vector<1x128xf32>
      %32 = arith.mulf %28, %31 : vector<1x128xf32>
      %33 = arith.mulf %30, %30 : vector<1x128xf32>
      %34 = arith.subf %32, %33 : vector<1x128xf32>
      %cst_25 = arith.constant 0.000000e+00 : f32
      %35 = vector.broadcast %cst_25 : f32 to vector<1x128xf32>
      %36 = arith.maximumf %34, %35 : vector<1x128xf32>
      %c0_26 = arith.constant 0 : index
      %c0_27 = arith.constant 0 : index
      %37 = vector.load %arg3[%c0_26, %c0_27] : memref<1x128xf32, #tpu.memory_space<vmem>>, vector<1x128xf32>
      %cst_28 = arith.constant 9.99999974E-6 : f32
      %38 = vector.broadcast %cst_28 : f32 to vector<1x128xf32>
      %39 = arith.addf %36, %38 : vector<1x128xf32>
      %40 = math.rsqrt %39 : vector<1x128xf32>
      %41 = arith.mulf %37, %40 : vector<1x128xf32>
      %c0_29 = arith.constant 0 : index
      %c0_30 = arith.constant 0 : index
      %42 = vector.load %arg4[%c0_29, %c0_30] : memref<1x128xf32, #tpu.memory_space<vmem>>, vector<1x128xf32>
      %43 = arith.mulf %30, %41 : vector<1x128xf32>
      %44 = arith.subf %42, %43 : vector<1x128xf32>
      %c0_31 = arith.constant 0 : index
      %c0_32 = arith.constant 0 : index
      %45 = vector.load %arg6[%c0_31, %c0_32] : memref<64x128xf32, #tpu.memory_space<vmem>>, vector<64x128xf32>
      %46 = vector.broadcast %41 : vector<1x128xf32> to vector<64x128xf32>
      %47 = arith.mulf %45, %46 : vector<64x128xf32>
      %48 = vector.broadcast %44 : vector<1x128xf32> to vector<64x128xf32>
      %49 = arith.addf %47, %48 : vector<64x128xf32>
      %cst_33 = arith.constant 0.000000e+00 : f32
      %50 = vector.broadcast %cst_33 : f32 to vector<64x128xf32>
      %51 = arith.cmpf ogt, %49, %50 : vector<64x128xf32>
      %cst_34 = arith.constant 2.000000e-01 : f32
      %52 = vector.broadcast %cst_34 : f32 to vector<64x128xf32>
      %53 = arith.mulf %52, %49 : vector<64x128xf32>
      %54 = arith.select %51, %49, %53 : vector<64x128xi1>, vector<64x128xf32>
      %55 = arith.truncf %54 : vector<64x128xf32> to vector<64x128xbf16>
      %c0_35 = arith.constant 0 : index
      %c0_36 = arith.constant 0 : index
      %56 = vector.load %arg5[%c0_35, %c0_36] : memref<64x128xbf16, #tpu.memory_space<vmem>>, vector<64x128xbf16>
      tpu.vector_store %arg5[%c0_35, %c0_36], %55 {strides = array<i32>} : memref<64x128xbf16, #tpu.memory_space<vmem>>, vector<64x128xbf16>,
    } else {
    }
    return
  }
  func.func @transform_0(%arg0: i32) -> (i32, i32) {
    %c0_i32 = arith.constant 0 : i32
    %c0_i32_0 = arith.constant 0 : i32
    return %arg0, %c0_i32 : i32, i32
  }
  func.func @transform_1(%arg0: i32) -> (i32, i32) {
    %c0_i32 = arith.constant 0 : i32
    %c0_i32_0 = arith.constant 0 : i32
    %c0_i32_1 = arith.constant 0 : i32
    return %c0_i32, %c0_i32_0 : i32, i32
  }
  func.func @transform_2(%arg0: i32) -> (i32, i32) {
    %c0_i32 = arith.constant 0 : i32
    %c0_i32_0 = arith.constant 0 : i32
    %c0_i32_1 = arith.constant 0 : i32
    return %c0_i32, %c0_i32_0 : i32, i32
  }
  func.func @transform_3(%arg0: i32) -> (i32, i32) {
    %c0_i32 = arith.constant 0 : i32
    %c0_i32_0 = arith.constant 0 : i32
    %c0_i32_1 = arith.constant 0 : i32
    return %c0_i32, %c0_i32_0 : i32, i32
  }
  func.func @transform_4(%arg0: i32) -> (i32, i32) {
    %c0_i32 = arith.constant 0 : i32
    %c0_i32_0 = arith.constant 0 : i32
    %c0_i32_1 = arith.constant 0 : i32
    return %c0_i32, %c0_i32_0 : i32, i32
  }
}

module attributes {stable_mosaic.version = 11 : i64} {
  func.func @_matmul_tanh_kernel(%arg0: i32, %arg1: memref<16x512xbf16, #tpu.memory_space<vmem>>, %arg2: memref<512x128xbf16, #tpu.memory_space<vmem>>, %arg3: memref<16x128xf32, #tpu.memory_space<vmem>>) attributes {dimension_semantics = [#tpu.dimension_semantics<parallel>], iteration_bounds = array<i64: 1>, scalar_prefetch = 0 : i64, scratch_operands = 0 : i64, tpu.core_type = #tpu.core_type<tc>, window_params = [{transform_indices = @transform_0, window_bounds = array<i64: 16, 512>}, {pipeline_mode = #tpu.pipeline_mode<synchronous>, transform_indices = @transform_1, window_bounds = array<i64: 512, 128>}, {transform_indices = @transform_2, window_bounds = array<i64: 16, 128>}]} {
    %c0 = arith.constant 0 : index
    %c0_0 = arith.constant 0 : index
    %0 = vector.load %arg1[%c0, %c0_0] : memref<16x512xbf16, #tpu.memory_space<vmem>>, vector<16x512xbf16>
    %c0_1 = arith.constant 0 : index
    %c0_2 = arith.constant 0 : index
    %1 = vector.load %arg2[%c0_1, %c0_2] : memref<512x128xbf16, #tpu.memory_space<vmem>>, vector<512x128xbf16>
    %cst = arith.constant dense<0.000000e+00> : vector<16x128xf32>
    %2 = tpu.matmul %0, %1, %cst {dimension_numbers = #tpu.dot_dimension_numbers<[1], [0], [0], [1], [0, 0, 1, 1], [], []>} : vector<16x512xbf16>, vector<512x128xbf16>, vector<16x128xf32> -> vector<16x128xf32>
    %3 = math.tanh %2 : vector<16x128xf32>
    %c0_3 = arith.constant 0 : index
    %c0_4 = arith.constant 0 : index
    %4 = vector.load %arg3[%c0_3, %c0_4] : memref<16x128xf32, #tpu.memory_space<vmem>>, vector<16x128xf32>
    tpu.vector_store %arg3[%c0_3, %c0_4], %3 {strides = array<i32>} : memref<16x128xf32, #tpu.memory_space<vmem>>, vector<16x128xf32>,
    return
  }
  func.func @transform_0(%arg0: i32) -> (i32, i32) {
    %c0_i32 = arith.constant 0 : i32
    %c0_i32_0 = arith.constant 0 : i32
    return %arg0, %c0_i32 : i32, i32
  }
  func.func @transform_1(%arg0: i32) -> (i32, i32) {
    %c0_i32 = arith.constant 0 : i32
    %c0_i32_0 = arith.constant 0 : i32
    %c0_i32_1 = arith.constant 0 : i32
    return %c0_i32, %c0_i32_0 : i32, i32
  }
  func.func @transform_2(%arg0: i32) -> (i32, i32) {
    %c0_i32 = arith.constant 0 : i32
    %c0_i32_0 = arith.constant 0 : i32
    return %arg0, %c0_i32 : i32, i32
  }
}

</mosaic_0001>

<bundles_post_ra>
// kernel: _lambda_.3
= control target key start
LH: loop header
LB: loop body
LE: loop exit
PB: predicated region body
PF: predicated region fallthrough
CT: control target
= control target key end

     0   :  { %s2387_s1 = inlined_call_operand.vmem [shape: bf16[128,128], index: 1, kind: input, shape index: {}]   ;;  %s2388_s0 = inlined_call_operand.vmem [shape: bf16[352,128], index: 0, kind: input, shape index: {}]   ;;  %s2389_s2 = inlined_call_operand.vmem [shape: f32[1,128], index: 2, kind: input, shape index: {}]   ;;  %s2390_s3 = inlined_call_operand.vmem [shape: f32[1,128], index: 3, kind: input, shape index: {}]   ;;  %s2391_s4 = inlined_call_operand.vmem [shape: bf16[352,128], index: 4, kind: output, shape index: {}]  }
   0x1   :  { %v1539_v0 = vld [vmem:[%s2387_s1] sm:$0xff]   ;;  %v1540_v1 = vld [vmem:[%s2387_s1 + $0x8] sm:$0xff]   ;;  %v1541_v2 = vld [vmem:[%s2387_s1 + $0x10] sm:$0xff]  }
   0x2   :  { %1463 = vmatprep.subr.bf16.mxu0 %v1539_v0  ;;  %1523 = vmatprep.subr.bf16.mxu1 %v1539_v0  ;;  %v1542_v3 = vld [vmem:[%s2387_s1 + $0x18] sm:$0xff]   ;;  %v1547_v4 = vld [vmem:[%s2388_s0] sm:$0xff]   ;;  %v1544_v6 = vld [vmem:[%s2387_s1 + $0x28] sm:$0xff]  }
   0x3   :  { %1464 = vmatpush3.bf16.msra.mxu0 %v1539_v0  ;;  %1531 = vmatpush3.bf16.msra.mxu1 %v1539_v0  ;;  %v1543_v5 = vld [vmem:[%s2387_s1 + $0x20] sm:$0xff]   ;;  %v1545_v7 = vld [vmem:[%s2387_s1 + $0x30] sm:$0xff]   ;;  %v1546_v9 = vld [vmem:[%s2387_s1 + $0x38] sm:$0xff]  }
   0x4   :  { %1465 = vmatprep.subr.bf16.mxu0 %v1540_v1  ;;  %1524 = vmatprep.subr.bf16.mxu1 %v1540_v1  ;;  %v1559_v8 = vld [vmem:[%s2388_s0 + $0x60] sm:$0xff]   ;;  %v1548_v10 = vld [vmem:[%s2388_s0 + $0x8] sm:$0xff]   ;;  %v1549_v12 = vld [vmem:[%s2388_s0 + $0x10] sm:$0xff]  }
   0x5   :  { %1479 = vmatprep.mubr.bf16.mxu0 %v1547_v4  ;;  %1503 = vmatprep.mubr.bf16.mxu1 %v1559_v8  ;;  %v1560_v11 = vld [vmem:[%s2388_s0 + $0x68] sm:$0xff]   ;;  %v1561_v13 = vld [vmem:[%s2388_s0 + $0x70] sm:$0xff]   ;;  %v1550_v14 = vld [vmem:[%s2388_s0 + $0x18] sm:$0xff]  }
   0x6   :  { %v1562_v15 = vld [vmem:[%s2388_s0 + $0x78] sm:$0xff]   ;;  %v1551_v16 = vld [vmem:[%s2388_s0 + $0x20] sm:$0xff]   ;;  %v1552_v18 = vld [vmem:[%s2388_s0 + $0x28] sm:$0xff]  }
   0x7   :  { %1466 = vmatpush3.bf16.msra.mxu0 %v1540_v1  ;;  %1532 = vmatpush3.bf16.msra.mxu1 %v1540_v1  ;;  %v1563_v17 = vld [vmem:[%s2388_s0 + $0x80] sm:$0xff]   ;;  %v1564_v19 = vld [vmem:[%s2388_s0 + $0x88] sm:$0xff]   ;;  %v1553_v20 = vld [vmem:[%s2388_s0 + $0x30] sm:$0xff]  }
   0x8   :  { %1467 = vmatprep.subr.bf16.mxu0 %v1541_v2  ;;  %1525 = vmatprep.subr.bf16.mxu1 %v1541_v2  ;;  %v1565_v21 = vld [vmem:[%s2388_s0 + $0x90] sm:$0xff]   ;;  %v1554_v22 = vld [vmem:[%s2388_s0 + $0x38] sm:$0xff]   ;;  %v1555_v24 = vld [vmem:[%s2388_s0 + $0x40] sm:$0xff]  }
   0x9   :  { %v1566_v23 = vld [vmem:[%s2388_s0 + $0x98] sm:$0xff]   ;;  %v1567_v25 = vld [vmem:[%s2388_s0 + $0xa0] sm:$0xff]   ;;  %v1556_v26 = vld [vmem:[%s2388_s0 + $0x48] sm:$0xff]  }
   0xa   :  { %v1568_v27 = vld [vmem:[%s2388_s0 + $0xa8] sm:$0xff]   ;;  %v1557_v28 = vld [vmem:[%s2388_s0 + $0x50] sm:$0xff]   ;;  %v1558_v29 = vld [vmem:[%s2388_s0 + $0x58] sm:$0xff]  }
   0xb   :  { %1468 = vmatpush3.bf16.msra.mxu0 %v1541_v2  ;;  %1533 = vmatpush3.bf16.msra.mxu1 %v1541_v2 }
   0xc   :  { %1469 = vmatprep.subr.bf16.mxu0 %v1542_v3  ;;  %1526 = vmatprep.subr.bf16.mxu1 %v1542_v3 }
   0xf   :  { %1470 = vmatpush3.bf16.msra.mxu0 %v1542_v3  ;;  %1534 = vmatpush3.bf16.msra.mxu1 %v1542_v3 }
  0x10   :  { %1471 = vmatprep.subr.bf16.mxu0 %v1543_v5  ;;  %1527 = vmatprep.subr.bf16.mxu1 %v1543_v5 }
  0x13   :  { %1472 = vmatpush3.bf16.msra.mxu0 %v1543_v5  ;;  %1535 = vmatpush3.bf16.msra.mxu1 %v1543_v5 }
  0x14   :  { %1473 = vmatprep.subr.bf16.mxu0 %v1544_v6  ;;  %1528 = vmatprep.subr.bf16.mxu1 %v1544_v6 }
  0x17   :  { %1474 = vmatpush3.bf16.msra.mxu0 %v1544_v6  ;;  %1536 = vmatpush3.bf16.msra.mxu1 %v1544_v6 }
  0x18   :  { %1475 = vmatprep.subr.bf16.mxu0 %v1545_v7  ;;  %1529 = vmatprep.subr.bf16.mxu1 %v1545_v7 }
  0x1b   :  { %1476 = vmatpush3.bf16.msra.mxu0 %v1545_v7  ;;  %1537 = vmatpush3.bf16.msra.mxu1 %v1545_v7 }
  0x1c   :  { %1477 = vmatprep.subr.bf16.mxu0 %v1546_v9  ;;  %1530 = vmatprep.subr.bf16.mxu1 %v1546_v9 }
  0x1f   :  { %1478 = vmatpush3.bf16.msra.mxu0 %v1546_v9  ;;  %1538 = vmatpush3.bf16.msra.mxu1 %v1546_v9 }
  0x22   :  { %1480 = vmatmul.mubr.bf16.vlgmr.msra.gmra.mrb[0].mxu0 %v1548_v10  ;;  %1504 = vmatmul.mubr.bf16.vlgmr.msra.gmra.mrb[0].mxu1 %v1560_v11 }
  0x23   :  { %1483 = vmatprep.mubr.bf16.mxu0 %v1549_v12  ;;  %1507 = vmatprep.mubr.bf16.mxu1 %v1561_v13 }
  0x2a   :  { %1484 = vmatmul.mubr.bf16.gmra.mrb[4].mxu0 %v1550_v14  ;;  %1508 = vmatmul.mubr.bf16.gmra.mrb[4].mxu1 %v1562_v15 }
  0x2b   :  { %1487 = vmatprep.mubr.bf16.mxu0 %v1551_v16  ;;  %1511 = vmatprep.mubr.bf16.mxu1 %v1563_v17 }
  0x32   :  { %1488 = vmatmul.mubr.bf16.gmra.mrb[8].mxu0 %v1552_v18  ;;  %1512 = vmatmul.mubr.bf16.gmra.mrb[8].mxu1 %v1564_v19 }
  0x33   :  { %1491 = vmatprep.mubr.bf16.mxu0 %v1553_v20  ;;  %1515 = vmatprep.mubr.bf16.mxu1 %v1565_v21 }
  0x3a   :  { %1492 = vmatmul.mubr.bf16.gmra.mrb[12].mxu0 %v1554_v22  ;;  %1516 = vmatmul.mubr.bf16.gmra.mrb[12].mxu1 %v1566_v23 }
  0x3b   :  { %1495 = vmatprep.mubr.bf16.mxu0 %v1555_v24  ;;  %1519 = vmatprep.mubr.bf16.mxu1 %v1567_v25 }
  0x42   :  { %1496 = vmatmul.mubr.bf16.gmra.mrb[16].mxu0 %v1556_v26  ;;  %1520 = vmatmul.mubr.bf16.gmra.mrb[16].mxu1 %v1568_v27 }
  0x43   :  { %1499 = vmatprep.mubr.bf16.mxu0 %v1557_v28 }
  0x4a   :  { %1500 = vmatmul.mubr.bf16.gmra.mrb[20].mxu0 %v1558_v29 }
  0xf5   :  { %v1686_v30 = vpop.f32.mrb[0].mxu0  ;;  %v1688_v31 = vpop.f32.mrb[0].mxu1 }
  0xf6   :  { %v1690_v32 = vpop.f32.mrb[1].mxu0  ;;  %v1692_v33 = vpop.f32.mrb[1].mxu1  ;;  %v568_v41 = vmul.f32 %v1686_v30, %v1686_v30 }
  0xf7   :  { %v1694_v34 = vpop.f32.mrb[2].mxu0  ;;  %v1696_v35 = vpop.f32.mrb[2].mxu1  ;;  %v566_v38 = vmul.f32 %v1690_v32, %v1690_v32 }
  0xf8   :  { %v1698_v36 = vpop.f32.mrb[3].mxu0  ;;  %v1700_v37 = vpop.f32.mrb[3].mxu1  ;;  %v569_v44 = vmul.f32 %v1694_v34, %v1694_v34 }
  0xf9   :  { %v520_v39 = vadd.f32 %v1698_v36, %v1690_v32  ;;  %v567_v40 = vmul.f32 %v1698_v36, %v1698_v36 }
  0xfb   :  { %v521_v42 = vadd.f32 %v1686_v30, %v520_v39  ;;  %v610_v43 = vadd.f32 %v567_v40, %v566_v38 }
  0xfd   :  { %v611_v45 = vadd.f32 %v610_v43, %v568_v41  ;;  %v1713_v46 = vpop.f32.mrb[4].mxu0  ;;  %v522_v47 = vadd.f32 %v1694_v34, %v521_v42  ;;  %v1716_v48 = vpop.f32.mrb[4].mxu1 }
  0xfe   :  { %v1718_v49 = vpop.f32.mrb[5].mxu0  ;;  %v1720_v50 = vpop.f32.mrb[5].mxu1  ;;  %v572_v61 = vmul.f32 %v1713_v46, %v1713_v46 }
  0xff   :  { %v523_v51 = vadd.f32 %v522_v47, %v1718_v49  ;;  %v570_v52 = vmul.f32 %v1718_v49, %v1718_v49  ;;  %v612_v53 = vadd.f32 %v611_v45, %v569_v44  ;;  %v1725_v54 = vpop.f32.mrb[6].mxu0  ;;  %v1727_v55 = vpop.f32.mrb[6].mxu1 }
 0x100   :  { %v1729_v56 = vpop.f32.mrb[7].mxu0  ;;  %v1731_v57 = vpop.f32.mrb[7].mxu1  ;;  %v573_v0 = vmul.f32 %v1725_v54, %v1725_v54 }
 0x101   :  { %v613_v58 = vadd.f32 %v612_v53, %v570_v52  ;;  %v524_v59 = vadd.f32 %v523_v51, %v1729_v56  ;;  %v571_v60 = vmul.f32 %v1729_v56, %v1729_v56 }
 0x103   :  { %v525_v62 = vadd.f32 %v1713_v46, %v524_v59  ;;  %v614_v63 = vadd.f32 %v613_v58, %v571_v60 }
 0x105   :  { %v615_v1 = vadd.f32 %v614_v63, %v572_v61  ;;  %v1741_v2 = vpop.f32.mrb[8].mxu0  ;;  %v526_v3 = vadd.f32 %v1725_v54, %v525_v62  ;;  %v1744_v4 = vpop.f32.mrb[8].mxu1 }
 0x106   :  { %v1746_v5 = vpop.f32.mrb[9].mxu0  ;;  %v1748_v6 = vpop.f32.mrb[9].mxu1  ;;  %v576_v17 = vmul.f32 %v1741_v2, %v1741_v2 }
 0x107   :  { %v527_v7 = vadd.f32 %v526_v3, %v1746_v5  ;;  %v574_v8 = vmul.f32 %v1746_v5, %v1746_v5  ;;  %v616_v9 = vadd.f32 %v615_v1, %v573_v0  ;;  %v1753_v10 = vpop.f32.mrb[10].mxu0  ;;  %v1755_v11 = vpop.f32.mrb[10].mxu1 }
 0x108   :  { %v1757_v12 = vpop.f32.mrb[11].mxu0  ;;  %v1759_v13 = vpop.f32.mrb[11].mxu1  ;;  %v577_v20 = vmul.f32 %v1753_v10, %v1753_v10 }
 0x109   :  { %v617_v14 = vadd.f32 %v616_v9, %v574_v8  ;;  %v528_v15 = vadd.f32 %v527_v7, %v1757_v12  ;;  %v575_v16 = vmul.f32 %v1757_v12, %v1757_v12 }
 0x10b   :  { %v529_v18 = vadd.f32 %v1741_v2, %v528_v15  ;;  %v618_v19 = vadd.f32 %v617_v14, %v575_v16 }
 0x10d   :  { %v619_v21 = vadd.f32 %v618_v19, %v576_v17  ;;  %v1769_v22 = vpop.f32.mrb[12].mxu0  ;;  %v530_v23 = vadd.f32 %v1753_v10, %v529_v18  ;;  %v1772_v24 = vpop.f32.mrb[12].mxu1 }
 0x10e   :  { %v1774_v25 = vpop.f32.mrb[13].mxu0  ;;  %v1776_v26 = vpop.f32.mrb[13].mxu1  ;;  %v580_v45 = vmul.f32 %v1769_v22, %v1769_v22 }
 0x10f   :  { %v531_v27 = vadd.f32 %v530_v23, %v1774_v25  ;;  %v578_v28 = vmul.f32 %v1774_v25, %v1774_v25  ;;  %v620_v29 = vadd.f32 %v619_v21, %v577_v20  ;;  %v1781_v38 = vpop.f32.mrb[14].mxu0  ;;  %v1783_v39 = vpop.f32.mrb[14].mxu1 }
 0x110   :  { %2412 = vst [vmem:[#allocation5_spill] sm:$0xff] %v1783_v39  ;;  %v1785_v40 = vpop.f32.mrb[15].mxu0  ;;  %v1787_v41 = vpop.f32.mrb[15].mxu1  ;;  %v581_v52 = vmul.f32 %v1781_v38, %v1781_v38 }
 0x111   :  { %v621_v42 = vadd.f32 %v620_v29, %v578_v28  ;;  %v532_v43 = vadd.f32 %v531_v27, %v1785_v40  ;;  %v579_v44 = vmul.f32 %v1785_v40, %v1785_v40 }
 0x113   :  { %v533_v47 = vadd.f32 %v1769_v22, %v532_v43  ;;  %v622_v51 = vadd.f32 %v621_v42, %v579_v44 }
 0x115   :  { %v623_v53 = vadd.f32 %v622_v51, %v580_v45  ;;  %v1797_v58 = vpop.f32.mrb[16].mxu0  ;;  %v534_v59 = vadd.f32 %v1781_v38, %v533_v47  ;;  %v1800_v60 = vpop.f32.mrb[16].mxu1 }
 0x116   :  { %2413 = vst [vmem:[#allocation6_spill] sm:$0xff] %v1800_v60  ;;  %v1802_v61 = vpop.f32.mrb[17].mxu0  ;;  %v1804_v62 = vpop.f32.mrb[17].mxu1  ;;  %v584_v17 = vmul.f32 %v1797_v58, %v1797_v58 }
 0x117   :  { %2414 = vst [vmem:[#allocation7_spill] sm:$0xff] %v1804_v62  ;;  %v535_v63 = vadd.f32 %v534_v59, %v1802_v61  ;;  %v582_v0 = vmul.f32 %v1802_v61, %v1802_v61  ;;  %v624_v1 = vadd.f32 %v623_v53, %v581_v52  ;;  %v1809_v3 = vpop.f32.mrb[18].mxu0  ;;  %v1811_v7 = vpop.f32.mrb[18].mxu1 }
 0x118   :  { %v1813_v8 = vpop.f32.mrb[19].mxu0  ;;  %v1815_v9 = vpop.f32.mrb[19].mxu1  ;;  %v585_v20 = vmul.f32 %v1809_v3, %v1809_v3 }
 0x119   :  { %2415 = vst [vmem:[#allocation8_spill] sm:$0xff] %v1815_v9  ;;  %v625_v14 = vadd.f32 %v624_v1, %v582_v0  ;;  %v536_v15 = vadd.f32 %v535_v63, %v1813_v8  ;;  %v583_v16 = vmul.f32 %v1813_v8, %v1813_v8 }
 0x11b   :  { %v537_v18 = vadd.f32 %v1797_v58, %v536_v15  ;;  %v626_v19 = vadd.f32 %v625_v14, %v583_v16  ;;  %v590_v15 = vmul.f32 %v1692_v33, %v1692_v33 }
 0x11d   :  { %v627_v21 = vadd.f32 %v626_v19, %v584_v17  ;;  %v1825_v23 = vpop.f32.mrb[20].mxu0  ;;  %v538_v27 = vadd.f32 %v1809_v3, %v537_v18 }
 0x11e   :  { %v1828_v28 = vpop.f32.mrb[21].mxu0  ;;  %v588_v53 = vmul.f32 %v1825_v23, %v1825_v23 }
 0x11f   :  { %v539_v29 = vadd.f32 %v538_v27, %v1828_v28  ;;  %v586_v42 = vmul.f32 %v1828_v28, %v1828_v28  ;;  %v628_v43 = vadd.f32 %v627_v21, %v585_v20  ;;  %v1833_v44 = vpop.f32.mrb[22].mxu0  ;;  %v591_v20 = vmul.f32 %v1700_v37, %v1700_v37 }
 0x120   :  { %v1835_v45 = vpop.f32.mrb[23].mxu0  ;;  %v589_v0 = vmul.f32 %v1833_v44, %v1833_v44  ;;  %v592_v21 = vmul.f32 %v1688_v31, %v1688_v31 }
 0x121   :  { %v629_v47 = vadd.f32 %v628_v43, %v586_v42  ;;  %v540_v51 = vadd.f32 %v539_v29, %v1835_v45  ;;  %v587_v52 = vmul.f32 %v1835_v45, %v1835_v45  ;;  %v593_v42 = vmul.f32 %v1696_v35, %v1696_v35 }
 0x123   :  { %v541_v59 = vadd.f32 %v1825_v23, %v540_v51  ;;  %v630_v63 = vadd.f32 %v629_v47, %v587_v52  ;;  %v594_v51 = vmul.f32 %v1720_v50, %v1720_v50 }
 0x125   :  { %v631_v1 = vadd.f32 %v630_v63, %v588_v53  ;;  %v542_v14 = vadd.f32 %v1833_v44, %v541_v59 }
 0x127   :  { %v543_v16 = vadd.f32 %v542_v14, %v1692_v33  ;;  %v632_v17 = vadd.f32 %v631_v1, %v589_v0  ;;  %v595_v0 = vmul.f32 %v1731_v57, %v1731_v57  ;;  %v596_v1 = vmul.f32 %v1716_v48, %v1716_v48 }
 0x129   :  { %v633_v18 = vadd.f32 %v632_v17, %v590_v15  ;;  %v544_v19 = vadd.f32 %v543_v16, %v1700_v37  ;;  %v597_v16 = vmul.f32 %v1727_v55, %v1727_v55 }
 0x12b   :  { %v545_v27 = vadd.f32 %v1688_v31, %v544_v19  ;;  %v634_v29 = vadd.f32 %v633_v18, %v591_v20  ;;  %v598_v19 = vmul.f32 %v1748_v6, %v1748_v6 }
 0x12d   :  { %v635_v43 = vadd.f32 %v634_v29, %v592_v21  ;;  %v546_v47 = vadd.f32 %v1696_v35, %v545_v27 }
 0x12f   :  { %v547_v52 = vadd.f32 %v546_v47, %v1720_v50  ;;  %v636_v53 = vadd.f32 %v635_v43, %v593_v42  ;;  %v599_v42 = vmul.f32 %v1759_v13, %v1759_v13  ;;  %v600_v43 = vmul.f32 %v1744_v4, %v1744_v4 }
 0x131   :  { %v637_v59 = vadd.f32 %v636_v53, %v594_v51  ;;  %v548_v63 = vadd.f32 %v547_v52, %v1731_v57  ;;  %v601_v52 = vmul.f32 %v1755_v11, %v1755_v11 }
 0x133   :  { %v549_v14 = vadd.f32 %v1716_v48, %v548_v63  ;;  %v638_v15 = vadd.f32 %v637_v59, %v595_v0  ;;  %v602_v63 = vmul.f32 %v1776_v26, %v1776_v26 }
 0x135   :  { %v639_v17 = vadd.f32 %v638_v15, %v596_v1  ;;  %v550_v18 = vadd.f32 %v1727_v55, %v549_v14 }
 0x137   :  { %v551_v20 = vadd.f32 %v550_v18, %v1748_v6  ;;  %v640_v21 = vadd.f32 %v639_v17, %v597_v16  ;;  %v603_v16 = vmul.f32 %v1787_v41, %v1787_v41  ;;  %v604_v17 = vmul.f32 %v1772_v24, %v1772_v24 }
 0x139   :  { %v641_v27 = vadd.f32 %v640_v21, %v598_v19  ;;  %v552_v29 = vadd.f32 %v551_v20, %v1759_v13  ;;  %v605_v20 = vmul.f32 %v1783_v39, %v1783_v39 }
 0x13b   :  { %v553_v47 = vadd.f32 %v1744_v4, %v552_v29  ;;  %v642_v51 = vadd.f32 %v641_v27, %v599_v42  ;;  %v606_v29 = vmul.f32 %v1804_v62, %v1804_v62 }
 0x13d   :  { %v643_v53 = vadd.f32 %v642_v51, %v600_v43  ;;  %v554_v59 = vadd.f32 %v1755_v11, %v553_v47 }
 0x13f   :  { %v555_v0 = vadd.f32 %v554_v59, %v1776_v26  ;;  %v644_v1 = vadd.f32 %v643_v53, %v601_v52  ;;  %v607_v52 = vmul.f32 %v1815_v9, %v1815_v9  ;;  %v608_v53 = vmul.f32 %v1800_v60, %v1800_v60 }
 0x141   :  { %v645_v14 = vadd.f32 %v644_v1, %v602_v63  ;;  %v556_v15 = vadd.f32 %v555_v0, %v1787_v41  ;;  %v609_v0 = vmul.f32 %v1811_v7, %v1811_v7 }
 0x143   :  { %v557_v18 = vadd.f32 %v1772_v24, %v556_v15  ;;  %v646_v19 = vadd.f32 %v645_v14, %v603_v16 }
 0x145   :  { %v647_v21 = vadd.f32 %v646_v19, %v604_v17  ;;  %v558_v27 = vadd.f32 %v1783_v39, %v557_v18 }
 0x147   :  { %v559_v42 = vadd.f32 %v558_v27, %v1804_v62  ;;  %v648_v43 = vadd.f32 %v647_v21, %v605_v20 }
 0x149   :  { %v649_v47 = vadd.f32 %v648_v43, %v606_v29  ;;  %v560_v51 = vadd.f32 %v559_v42, %v1815_v9 }
 0x14b   :  { %v561_v59 = vadd.f32 %v1800_v60, %v560_v51  ;;  %v650_v63 = vadd.f32 %v649_v47, %v607_v52 }
 0x14d   :  { %v562_v1 = vadd.f32 %v1811_v7, %v561_v59  ;;  %v651_v14 = vadd.f32 %v650_v63, %v608_v53  ;;  %v729_v53 = vlaneseq }
 0x14f   :  { %v652_v15 = vadd.f32 %v651_v14, %v609_v0  ;;  %v659_v16 = vrot.slane %v562_v1, 4  ;;  %v730_v63 = vshrl.u32 %v729_v53, 7  ;;  %v677_v0 = vld [vmem:[%s2389_s2] sm:$0x1] }
 0x151   :  { %v660_v17 = vadd.f32 %v659_v16, %v562_v1  ;;  %v666_v18 = vrot.slane %v652_v15, 4  ;;  %v731_v1 = vsub.s32 0, %v730_v63 }
 0x153   :  { %v661_v19 = vrot.slane %v660_v17, 2  ;;  %v667_v20 = vadd.f32 %v666_v18, %v652_v15 }
 0x155   :  { %v662_v21 = vadd.f32 %v661_v19, %v660_v17  ;;  %v668_v27 = vrot.slane %v667_v20, 2 }
 0x157   :  { %v663_v29 = vrot.slane %v662_v21, 1  ;;  %v669_v42 = vadd.f32 %v668_v27, %v667_v20 }
 0x159   :  { %v664_v43 = vadd.f32 %v663_v29, %v662_v21  ;;  %v670_v9 = vrot.slane %v669_v42, 1 }
 0x15b   :  { %v671_v51 = vadd.f32 %v670_v9, %v669_v42  ;;  %v672_v47 = vmul.f32 0.00295858, %v664_v43  ;;  %v681_v9 = vld [vmem:[%s2390_s3] sm:$0x1] }
 0x15d   :  { %v673_v52 = vmul.f32 0.00295858, %v671_v51  ;;  %v674_v60 = vmul.f32 %v672_v47, %v672_v47  ;;  %v2416_v51 = vld [vmem:[#allocation5_spill] sm:$0xff] }
 0x15f   :  { %v675_v62 = vsub.f32 %v673_v52, %v674_v60  ;;  %v2418_v52 = vld [vmem:[#allocation8_spill] sm:$0xff] }
 0x161   :  { %v676_v39 = vmax.f32 %v675_v62, 0.0 }
 0x163   :  { %v678_v59 = vadd.f32 1e-05, %v676_v39 }
 0x165   :  { %1569 = vrsqrt.f32 %v678_v59  ;;  %v2419_v59 = vld [vmem:[#allocation6_spill] sm:$0xff] }
 0x16f   :  { %v1570_v14 = vpop.eup %1569 }
 0x170   :  { %v680_v15 = vmul.f32 %v1570_v14, %v677_v0 }
 0x172   :  { %v682_v16 = vmul.f32 %v680_v15, %v672_v47  ;;  %v732_v17 = vrot.slane %v680_v15, %v731_v1  ;;  %v2417_v47 = vld [vmem:[#allocation7_spill] sm:$0xff] }
 0x174   :  { %v683_v18 = vsub.f32 %v681_v9, %v682_v16  ;;  %v734_v60 = vmul.f32 %v732_v17, %v1690_v32  ;;  %v735_v39 = vmul.f32 %v732_v17, %v1698_v36  ;;  %v736_v62 = vmul.f32 %v1686_v30, %v732_v17 }
 0x175   :  { %v737_v19 = vmul.f32 %v1694_v34, %v732_v17  ;;  %v738_v20 = vmul.f32 %v732_v17, %v1718_v49  ;;  %v739_v21 = vmul.f32 %v732_v17, %v1729_v56  ;;  %v740_v27 = vmul.f32 %v1713_v46, %v732_v17 }
 0x176   :  { %v741_v29 = vmul.f32 %v1725_v54, %v732_v17  ;;  %v742_v42 = vmul.f32 %v732_v17, %v1746_v5  ;;  %v743_v43 = vmul.f32 %v732_v17, %v1757_v12  ;;  %v744_v32 = vmul.f32 %v1741_v2, %v732_v17 }
 0x177   :  { %v745_v36 = vmul.f32 %v1753_v10, %v732_v17  ;;  %v746_v30 = vmul.f32 %v732_v17, %v1774_v25  ;;  %v747_v34 = vmul.f32 %v732_v17, %v1785_v40  ;;  %v748_v49 = vmul.f32 %v1769_v22, %v732_v17 }
 0x178   :  { %v749_v56 = vmul.f32 %v1781_v38, %v732_v17  ;;  %v750_v46 = vmul.f32 %v732_v17, %v1802_v61  ;;  %v751_v54 = vmul.f32 %v732_v17, %v1813_v8  ;;  %v752_v5 = vmul.f32 %v1797_v58, %v732_v17 }
 0x179   :  { %v753_v12 = vmul.f32 %v1809_v3, %v732_v17  ;;  %v754_v2 = vmul.f32 %v732_v17, %v1828_v28  ;;  %v755_v10 = vmul.f32 %v732_v17, %v1835_v45  ;;  %v756_v25 = vmul.f32 %v1825_v23, %v732_v17 }
 0x17a   :  { %v757_v40 = vmul.f32 %v1833_v44, %v732_v17  ;;  %v758_v22 = vmul.f32 %v732_v17, %v1692_v33  ;;  %v759_v38 = vmul.f32 %v732_v17, %v1700_v37  ;;  %v760_v61 = vmul.f32 %v1688_v31, %v732_v17 }
 0x17b   :  { %v761_v8 = vmul.f32 %v1696_v35, %v732_v17  ;;  %v762_v58 = vmul.f32 %v732_v17, %v1720_v50  ;;  %v763_v3 = vmul.f32 %v732_v17, %v1731_v57  ;;  %v764_v28 = vmul.f32 %v1716_v48, %v732_v17 }
 0x17c   :  { %v765_v45 = vmul.f32 %v1727_v55, %v732_v17  ;;  %v766_v23 = vmul.f32 %v732_v17, %v1748_v6  ;;  %v767_v44 = vmul.f32 %v732_v17, %v1759_v13  ;;  %v768_v33 = vmul.f32 %v1744_v4, %v732_v17 }
 0x17d   :  { %v769_v37 = vmul.f32 %v1755_v11, %v732_v17  ;;  %v770_v31 = vmul.f32 %v732_v17, %v1776_v26  ;;  %v771_v35 = vmul.f32 %v732_v17, %v1787_v41  ;;  %v772_v50 = vmul.f32 %v1772_v24, %v732_v17 }
 0x17e   :  { %v773_v57 = vmul.f32 %v2416_v51, %v732_v17  ;;  %v774_v48 = vmul.f32 %v732_v17, %v2417_v47  ;;  %v775_v55 = vmul.f32 %v732_v17, %v2418_v52  ;;  %v776_v6 = vmul.f32 %v2419_v59, %v732_v17 }
 0x17f   :  { %v777_v13 = vmul.f32 %v1811_v7, %v732_v17  ;;  %v782_v53 = vrot.slane %v683_v18, %v731_v1 }
 0x181   :  { %v1956_v4 = vadd.f32 %v782_v53, %v734_v60  ;;  %v1958_v11 = vadd.f32 %v782_v53, %v735_v39  ;;  %v1960_v26 = vadd.f32 %v782_v53, %v736_v62  ;;  %v1962_v41 = vadd.f32 %v782_v53, %v737_v19 }
 0x182   :  { %v1964_v24 = vadd.f32 %v782_v53, %v738_v20  ;;  %v1966_v63 = vadd.f32 %v782_v53, %v739_v21  ;;  %v1968_v0 = vadd.f32 %v782_v53, %v740_v27  ;;  %v1970_v14 = vadd.f32 %v782_v53, %v741_v29 }
 0x183   :  { %v1972_v15 = vadd.f32 %v782_v53, %v742_v42  ;;  %v1974_v7 = vadd.f32 %v782_v53, %v743_v43  ;;  %v1976_v1 = vadd.f32 %v782_v53, %v744_v32  ;;  %v1978_v9 = vadd.f32 %v782_v53, %v745_v36 }
 0x184   :  { %v1980_v16 = vadd.f32 %v782_v53, %v746_v30  ;;  %v1982_v17 = vadd.f32 %v782_v53, %v747_v34  ;;  %v1984_v18 = vadd.f32 %v782_v53, %v748_v49  ;;  %v1986_v60 = vadd.f32 %v782_v53, %v749_v56 }
 0x185   :  { %v1988_v39 = vadd.f32 %v782_v53, %v750_v46  ;;  %v1990_v62 = vadd.f32 %v782_v53, %v751_v54  ;;  %v1992_v19 = vadd.f32 %v782_v53, %v752_v5  ;;  %v1994_v20 = vadd.f32 %v782_v53, %v753_v12 }
 0x186   :  { %v1996_v21 = vadd.f32 %v782_v53, %v754_v2  ;;  %v1998_v27 = vadd.f32 %v782_v53, %v755_v10  ;;  %v2000_v29 = vadd.f32 %v782_v53, %v756_v25  ;;  %v2002_v42 = vadd.f32 %v782_v53, %v757_v40 }
 0x187   :  { %v2004_v43 = vadd.f32 %v782_v53, %v758_v22  ;;  %v2006_v32 = vadd.f32 %v782_v53, %v759_v38  ;;  %v2008_v36 = vadd.f32 %v782_v53, %v760_v61  ;;  %v2010_v30 = vadd.f32 %v782_v53, %v761_v8 }
 0x188   :  { %v2012_v34 = vadd.f32 %v782_v53, %v762_v58  ;;  %v2014_v49 = vadd.f32 %v782_v53, %v763_v3  ;;  %v2016_v56 = vadd.f32 %v782_v53, %v764_v28  ;;  %v2018_v46 = vadd.f32 %v782_v53, %v765_v45 }
 0x189   :  { %v2020_v54 = vadd.f32 %v782_v53, %v766_v23  ;;  %v2022_v5 = vadd.f32 %v782_v53, %v767_v44  ;;  %v2024_v12 = vadd.f32 %v782_v53, %v768_v33  ;;  %v2026_v2 = vadd.f32 %v782_v53, %v769_v37 }
 0x18a   :  { %2420 = vst [vmem:[#allocation5_spill] sm:$0xff] %v2016_v56  ;;  %2421 = vst [vmem:[#allocation7_spill] sm:$0xff] %v2018_v46  ;;  %v2028_v10 = vadd.f32 %v782_v53, %v770_v31  ;;  %v2030_v25 = vadd.f32 %v782_v53, %v771_v35  ;;  %v2032_v40 = vadd.f32 %v782_v53, %v772_v50  ;;  %vm828_vm0 = vcmp.gt.f32.partialorder %v1956_v4, 0.0 }
 0x18b   :  { %2422 = vst [vmem:[#allocation8_spill] sm:$0xff] %v2020_v54  ;;  %2423 = vst [vmem:[#allocation6_spill] sm:$0xff] %v2022_v5  ;;  %v2034_v22 = vadd.f32 %v782_v53, %v773_v57  ;;  %v2036_v38 = vadd.f32 %v782_v53, %v774_v48  ;;  %v2038_v61 = vadd.f32 %v782_v53, %v775_v55  ;;  %vm829_vm1 = vcmp.gt.f32.partialorder %v1958_v11, 0.0 }
 0x18c   :  { %2424 = vst [vmem:[#allocation9_spill] sm:$0xff] %v2024_v12  ;;  %2425 = vst [vmem:[#allocation10_spill] sm:$0xff] %v2026_v2  ;;  %v2040_v8 = vadd.f32 %v782_v53, %v776_v6  ;;  %v2042_v58 = vadd.f32 %v782_v53, %v777_v13  ;;  %vm830_vm2 = vcmp.gt.f32.partialorder %v1960_v26, 0.0  ;;  %vm831_vm3 = vcmp.gt.f32.partialorder %v1962_v41, 0.0 }
 0x18d   :  { %2426 = vst [vmem:[#allocation11_spill] sm:$0xff] %v2032_v40  ;;  %2427 = vst [vmem:[#allocation12_spill] sm:$0xff] %v2038_v61  ;;  %vm832_vm4 = vcmp.gt.f32.partialorder %v1964_v24, 0.0  ;;  %vm833_vm5 = vcmp.gt.f32.partialorder %v1966_v63, 0.0  ;;  %vm834_vm6 = vcmp.gt.f32.partialorder %v1968_v0, 0.0  ;;  %vm835_vm7 = vcmp.gt.f32.partialorder %v1970_v14, 0.0 }
 0x18e   :  { %vm836_vm8 = vcmp.gt.f32.partialorder %v1972_v15, 0.0  ;;  %vm837_vm9 = vcmp.gt.f32.partialorder %v1974_v7, 0.0  ;;  %v872_v3 = vmul.f32 0.2, %v1956_v4  ;;  %v873_v28 = vmul.f32 0.2, %v1958_v11 }
 0x18f   :  { %v874_v45 = vmul.f32 0.2, %v1960_v26  ;;  %vm838_vm10 = vcmp.gt.f32.partialorder %v1976_v1, 0.0  ;;  %v875_v23 = vmul.f32 0.2, %v1962_v41  ;;  %vm839_vm11 = vcmp.gt.f32.partialorder %v1978_v9, 0.0 }
 0x190   :  { %v876_v44 = vmul.f32 0.2, %v1964_v24  ;;  %v877_v33 = vmul.f32 0.2, %v1966_v63  ;;  %v878_v37 = vmul.f32 0.2, %v1968_v0  ;;  %v2070_v50 = vsel %vm828_vm0, %v1956_v4, %v872_v3 }
 0x191   :  { %v879_v31 = vmul.f32 0.2, %v1970_v14  ;;  %v2065_v35 = vmul.f32 0.2, %v1972_v15  ;;  %2428 = vst [vmem:[#allocation13_spill] sm:$0xff] %v2070_v50  ;;  %vm840_vm12 = vcmp.gt.f32.partialorder %v1980_v16, 0.0  ;;  %v2086_v48 = vsel %vm829_vm1, %v1958_v11, %v873_v28 }
 0x192   :  { %v2075_v51 = vmul.f32 0.2, %v1974_v7  ;;  %v2078_v57 = vmul.f32 0.2, %v1976_v1  ;;  %v2081_v47 = vmul.f32 0.2, %v1978_v9  ;;  %v2104_v6 = vsel %vm830_vm2, %v1960_v26, %v874_v45 }
 0x193   :  { %2429 = vst [vmem:[#allocation14_spill] sm:$0xff] %v2086_v48  ;;  %vm842_vm14 = vcmp.gt.f32.partialorder %v1984_v18, 0.0  ;;  %v2093_v52 = vmul.f32 0.2, %v1980_v16  ;;  %v2096_v55 = vmul.f32 0.2, %v1982_v17  ;;  %v2122_v11 = vsel %vm831_vm3, %v1962_v41, %v875_v23 }
 0x194   :  { %v2099_v59 = vmul.f32 0.2, %v1984_v18  ;;  %2430 = vst [vmem:[#allocation15_spill] sm:$0xff] %v2104_v6  ;;  %vm846_vm1 = vcmp.gt.f32.partialorder %v1992_v19, 0.0  ;;  %v2111_v13 = vmul.f32 0.2, %v1986_v60  ;;  %v2134_v45 = vsel %vm832_vm4, %v1964_v24, %v876_v44 }
 0x195   :  { %v2114_v53 = vmul.f32 0.2, %v1988_v39  ;;  %v2117_v4 = vmul.f32 0.2, %v1990_v62  ;;  %2431 = vst [vmem:[#allocation16_spill] sm:$0xff] %v2122_v11  ;;  %vm853_vm0 = vcmp.gt.f32.partialorder %v2006_v32, 0.0  ;;  %v2146_v6 = vsel %vm833_vm5, %v1966_v63, %v877_v33 }
 0x196   :  { %v890_v26 = vmul.f32 0.2, %v1992_v19  ;;  %v891_v3 = vmul.f32 0.2, %v1994_v20  ;;  %v892_v28 = vmul.f32 0.2, %v1996_v21  ;;  %v2158_v48 = vsel %vm834_vm6, %v1968_v0, %v878_v37 }
 0x197   :  { %2432 = vst [vmem:[#allocation17_spill] sm:$0xff] %v2134_v45  ;;  %vm857_vm15 = vcmp.gt.f32.partialorder %v2014_v49, 0.0  ;;  %v893_v41 = vmul.f32 0.2, %v1998_v27  ;;  %v894_v23 = vmul.f32 0.2, %v2000_v29  ;;  %v2170_v50 = vsel %vm835_vm7, %v1970_v14, %v879_v31 }
 0x198   :  { %v895_v11 = vmul.f32 0.2, %v2002_v42  ;;  %2433 = vst [vmem:[#allocation18_spill] sm:$0xff] %v2146_v6  ;;  %vm861_vm13 = vcmp.gt.f32.partialorder %v2022_v5, 0.0  ;;  %v896_v24 = vmul.f32 0.2, %v2004_v43  ;;  %v2183_v14 = vsel %vm836_vm8, %v1972_v15, %v2065_v35 }
 0x199   :  { %v897_v44 = vmul.f32 0.2, %v2006_v32  ;;  %v898_v45 = vmul.f32 0.2, %v2008_v36  ;;  %2434 = vst [vmem:[#allocation19_spill] sm:$0xff] %v2158_v48  ;;  %vm865_vm2 = vcmp.gt.f32.partialorder %v2030_v25, 0.0 }
 0x19a   :  { %v899_v63 = vmul.f32 0.2, %v2010_v30  ;;  %v900_v33 = vmul.f32 0.2, %v2012_v34  ;;  %v901_v6 = vmul.f32 0.2, %v2014_v49 }
 0x19b   :  { %2435 = vst [vmem:[#allocation20_spill] sm:$0xff] %v2170_v50  ;;  %vm866_vm6 = vcmp.gt.f32.partialorder %v2032_v40, 0.0  ;;  %vm868_vm4 = vcmp.gt.f32.partialorder %v2036_v38, 0.0  ;;  %vm869_vm3 = vcmp.gt.f32.partialorder %v2038_v61, 0.0  ;;  %v902_v0 = vmul.f32 0.2, %v2016_v56 }
 0x19c   :  { %v903_v37 = vmul.f32 0.2, %v2018_v46  ;;  %v904_v48 = vmul.f32 0.2, %v2020_v54  ;;  %2436 = vst [vmem:[#allocation21_spill] sm:$0xff] %v2183_v14  ;;  %vm870_vm7 = vcmp.gt.f32.partialorder %v2040_v8, 0.0  ;;  %v925_v54 = vsel %vm837_vm9, %v1974_v7, %v2075_v51 }
 0x19d   :  { %vm871_vm5 = vcmp.gt.f32.partialorder %v2042_v58, 0.0  ;;  %v905_v31 = vmul.f32 0.2, %v2022_v5  ;;  %v906_v50 = vmul.f32 0.2, %v2024_v12  ;;  %v926_v14 = vsel %vm838_vm10, %v1976_v1, %v2078_v57 }
 0x19e   :  { %v907_v56 = vmul.f32 0.2, %v2026_v2  ;;  %v908_v46 = vmul.f32 0.2, %v2028_v10  ;;  %v909_v15 = vmul.f32 0.2, %v2030_v25  ;;  %v927_v7 = vsel %vm839_vm11, %v1978_v9, %v2081_v47 }
 0x19f   :  { %v910_v35 = vmul.f32 0.2, %v2032_v40  ;;  %v911_v12 = vmul.f32 0.2, %v2034_v22  ;;  %v912_v2 = vmul.f32 0.2, %v2036_v38  ;;  %v928_v1 = vsel %vm840_vm12, %v1980_v16, %v2093_v52 }
 0x1a0   :  { %v913_v5 = vmul.f32 0.2, %v2038_v61  ;;  %v914_v51 = vmul.f32 0.2, %v2040_v8  ;;  %v915_v40 = vmul.f32 0.2, %v2042_v58  ;;  %v930_v61 = vsel %vm842_vm14, %v1984_v18, %v2099_v59 }
 0x1a1   :  { %vm2437_vm8 = vcmp.gt.f32.partialorder %v1982_v17, 0.0  ;;  %vm2438_vm9 = vcmp.gt.f32.partialorder %v1986_v60, 0.0  ;;  %vm2439_vm10 = vcmp.gt.f32.partialorder %v1988_v39, 0.0  ;;  %vm2440_vm11 = vcmp.gt.f32.partialorder %v1990_v62, 0.0  ;;  %v2450_v52 = vld [vmem:[#allocation5_spill] sm:$0xff]  ;;  %v2454_v59 = vld [vmem:[#allocation8_spill] sm:$0xff] }
 0x1a2   :  { %v929_v57 = vsel %vm2437_vm8, %v1982_v17, %v2096_v55  ;;  %v931_v9 = vsel %vm2438_vm9, %v1986_v60, %v2111_v13  ;;  %v932_v16 = vsel %vm2439_vm10, %v1988_v39, %v2114_v53  ;;  %v933_v17 = vsel %vm2440_vm11, %v1990_v62, %v2117_v4  ;;  %v2452_v55 = vld [vmem:[#allocation7_spill] sm:$0xff]  ;;  %v2456_v13 = vld [vmem:[#allocation6_spill] sm:$0xff]  ;;  %v2457_v53 = vld [vmem:[#allocation9_spill] sm:$0xff] }
 0x1a3   :  { %v934_v47 = vsel %vm846_vm1, %v1992_v19, %v890_v26  ;;  %vm2441_vm12 = vcmp.gt.f32.partialorder %v1994_v20, 0.0  ;;  %vm2442_vm14 = vcmp.gt.f32.partialorder %v1996_v21, 0.0  ;;  %vm2443_vm8 = vcmp.gt.f32.partialorder %v1998_v27, 0.0  ;;  %v2462_v26 = vld [vmem:[#allocation11_spill] sm:$0xff] }
 0x1a4   :  { %v935_v18 = vsel %vm2441_vm12, %v1994_v20, %v891_v3  ;;  %v936_v60 = vsel %vm2442_vm14, %v1996_v21, %v892_v28  ;;  %v937_v39 = vsel %vm2443_vm8, %v1998_v27, %v893_v41  ;;  %vm2444_vm9 = vcmp.gt.f32.partialorder %v2000_v29, 0.0  ;;  %v2464_v28 = vld [vmem:[#allocation12_spill] sm:$0xff]  ;;  %v2466_v41 = vld [vmem:[#allocation14_spill] sm:$0xff] }
 0x1a5   :  { %v938_v62 = vsel %vm2444_vm9, %v2000_v29, %v894_v23  ;;  %vm2445_vm10 = vcmp.gt.f32.partialorder %v2002_v42, 0.0  ;;  %vm2446_vm1 = vcmp.gt.f32.partialorder %v2004_v43, 0.0  ;;  %v941_v21 = vsel %vm853_vm0, %v2006_v32, %v897_v44  ;;  %v2469_v44 = vld [vmem:[#allocation17_spill] sm:$0xff] }
 0x1a6   :  { %v939_v19 = vsel %vm2445_vm10, %v2002_v42, %v895_v11  ;;  %v940_v20 = vsel %vm2446_vm1, %v2004_v43, %v896_v24  ;;  %vm2447_vm11 = vcmp.gt.f32.partialorder %v2008_v36, 0.0  ;;  %vm2448_vm12 = vcmp.gt.f32.partialorder %v2010_v30, 0.0 }
 0x1a7   :  { %v942_v27 = vsel %vm2447_vm11, %v2008_v36, %v898_v45  ;;  %v943_v29 = vsel %vm2448_vm12, %v2010_v30, %v899_v63  ;;  %vm2449_vm14 = vcmp.gt.f32.partialorder %v2012_v34, 0.0  ;;  %v945_v43 = vsel %vm857_vm15, %v2014_v49, %v901_v6  ;;  %v2459_v6 = vld [vmem:[#allocation10_spill] sm:$0xff]  ;;  %v2465_v45 = vld [vmem:[#allocation13_spill] sm:$0xff]  ;;  %v2471_v63 = vld [vmem:[#allocation19_spill] sm:$0xff] }
 0x1a8   :  { %v944_v42 = vsel %vm2449_vm14, %v2012_v34, %v900_v33  ;;  %vm2451_vm8 = vcmp.gt.f32.partialorder %v2450_v52, 0.0  ;;  %vm2453_vm0 = vcmp.gt.f32.partialorder %v2452_v55, 0.0  ;;  %vm2455_vm9 = vcmp.gt.f32.partialorder %v2454_v59, 0.0  ;;  %v2472_v33 = vld [vmem:[#allocation20_spill] sm:$0xff] }
 0x1a9   :  { %v946_v32 = vsel %vm2451_vm8, %v2450_v52, %v902_v0  ;;  %v947_v36 = vsel %vm2453_vm0, %v2452_v55, %v903_v37  ;;  %v948_v30 = vsel %vm2455_vm9, %v2454_v59, %v904_v48  ;;  %v949_v34 = vsel %vm861_vm13, %v2456_v13, %v905_v31  ;;  %v2473_v0 = vld [vmem:[#allocation21_spill] sm:$0xff] }
 0x1aa   :  { %vm2458_vm10 = vcmp.gt.f32.partialorder %v2457_v53, 0.0  ;;  %vm2460_vm15 = vcmp.gt.f32.partialorder %v2459_v6, 0.0  ;;  %vm2461_vm1 = vcmp.gt.f32.partialorder %v2028_v10, 0.0  ;;  %v953_v48 = vsel %vm865_vm2, %v2030_v25, %v909_v15 }
 0x1ab   :  { %v950_v49 = vsel %vm2458_vm10, %v2457_v53, %v906_v50  ;;  %v951_v4 = vsel %vm2460_vm15, %v2459_v6, %v907_v56  ;;  %v952_v11 = vsel %vm2461_vm1, %v2028_v10, %v908_v46  ;;  %v954_v3 = vsel %vm866_vm6, %v2462_v26, %v910_v35 }
 0x1ac   :  { %vm2463_vm13 = vcmp.gt.f32.partialorder %v2034_v22, 0.0  ;;  %v956_v56 = vsel %vm868_vm4, %v2036_v38, %v912_v2  ;;  %v957_v46 = vsel %vm869_vm3, %v2464_v28, %v913_v5  ;;  %v958_v10 = vsel %vm870_vm7, %v2040_v8, %v914_v51  ;;  %v2470_v2 = vld [vmem:[#allocation18_spill] sm:$0xff] }
 0x1ad   :  { %v955_v50 = vsel %vm2463_vm13, %v2034_v22, %v911_v12  ;;  %v959_v25 = vsel %vm871_vm5, %v2042_v58, %v915_v40  ;;  %v1305_v23 = vpack.c.bf16 %v2466_v41, %v2465_v45  ;;  %v2467_v12 = vld [vmem:[#allocation15_spill] sm:$0xff]  ;;  %v2468_v22 = vld [vmem:[#allocation16_spill] sm:$0xff]  ;;  %v1315_v38 = vpack.c.bf16 %v2470_v2, %v2469_v44 }
 0x1ae   :  { %v1310_v24 = vpack.c.bf16 %v2468_v22, %v2467_v12  ;;  %v1320_v5 = vpack.c.bf16 %v2472_v33, %v2471_v63  ;;  %v1325_v37 = vpack.c.bf16 %v925_v54, %v2473_v0  ;;  %v1330_v31 = vpack.c.bf16 %v927_v7, %v926_v14 }
 0x1af   :  { %1306 = vst [vmem:[%s2391_s4] sm:$0xff] %v1305_v23   ;;  %v1335_v40 = vpack.c.bf16 %v929_v57, %v928_v1  ;;  %v1340_v8 = vpack.c.bf16 %v931_v9, %v930_v61  ;;  %v1345_v58 = vpack.c.bf16 %v933_v17, %v932_v16  ;;  %v1350_v15 = vpack.c.bf16 %v935_v18, %v934_v47 }
 0x1b0   :  { %1412 = vst [vmem:[%s2391_s4 + $0x8] sm:$0xff] %v1310_v24   ;;  %1413 = vst [vmem:[%s2391_s4 + $0x10] sm:$0xff] %v1315_v38   ;;  %v1355_v54 = vpack.c.bf16 %v937_v39, %v936_v60  ;;  %v1360_v61 = vpack.c.bf16 %v939_v19, %v938_v62  ;;  %v1365_v14 = vpack.c.bf16 %v941_v21, %v940_v20 }
 0x1b1   :  { %1414 = vst [vmem:[%s2391_s4 + $0x18] sm:$0xff] %v1320_v5   ;;  %1415 = vst [vmem:[%s2391_s4 + $0x20] sm:$0xff] %v1325_v37   ;;  %v1370_v35 = vpack.c.bf16 %v943_v29, %v942_v27  ;;  %v1375_v7 = vpack.c.bf16 %v945_v43, %v944_v42  ;;  %v1380_v51 = vpack.c.bf16 %v947_v36, %v946_v32 }
 0x1b2   :  { %1416 = vst [vmem:[%s2391_s4 + $0x28] sm:$0xff] %v1330_v31   ;;  %1417 = vst [vmem:[%s2391_s4 + $0x30] sm:$0xff] %v1335_v40   ;;  %v1385_v1 = vpack.c.bf16 %v949_v34, %v948_v30  ;;  %v1390_v57 = vpack.c.bf16 %v951_v4, %v950_v49  ;;  %v1395_v9 = vpack.c.bf16 %v953_v48, %v952_v11 }
 0x1b3   :  { %1418 = vst [vmem:[%s2391_s4 + $0x38] sm:$0xff] %v1340_v8   ;;  %1419 = vst [vmem:[%s2391_s4 + $0x40] sm:$0xff] %v1345_v58   ;;  %v1400_v16 = vpack.c.bf16 %v955_v50, %v954_v3  ;;  %v1405_v17 = vpack.c.bf16 %v957_v46, %v956_v56  ;;  %v1410_v47 = vpack.c.bf16 %v959_v25, %v958_v10 }
 0x1b4   :  { %1420 = vst [vmem:[%s2391_s4 + $0x48] sm:$0xff] %v1350_v15   ;;  %1421 = vst [vmem:[%s2391_s4 + $0x50] sm:$0xff] %v1355_v54  }
 0x1b5   :  { %1422 = vst [vmem:[%s2391_s4 + $0x58] sm:$0xff] %v1360_v61   ;;  %1423 = vst [vmem:[%s2391_s4 + $0x60] sm:$0xff] %v1365_v14  }
 0x1b6   :  { %1424 = vst [vmem:[%s2391_s4 + $0x68] sm:$0xff] %v1370_v35   ;;  %1425 = vst [vmem:[%s2391_s4 + $0x70] sm:$0xff] %v1375_v7  }
 0x1b7   :  { %1426 = vst [vmem:[%s2391_s4 + $0x78] sm:$0xff] %v1380_v51   ;;  %1427 = vst [vmem:[%s2391_s4 + $0x80] sm:$0xff] %v1385_v1  }
 0x1b8   :  { %1428 = vst [vmem:[%s2391_s4 + $0x88] sm:$0xff] %v1390_v57   ;;  %1429 = vst [vmem:[%s2391_s4 + $0x90] sm:$0xff] %v1395_v9  }
 0x1b9   :  { %1430 = vst [vmem:[%s2391_s4 + $0x98] sm:$0xff] %v1400_v16   ;;  %1431 = vst [vmem:[%s2391_s4 + $0xa0] sm:$0xff] %v1405_v17  }
 0x1ba   :  { %1432 = vst [vmem:[%s2391_s4 + $0xa8] sm:$0xff] %v1410_v47  }

// kernel: _lambda_.4
= control target key start
LH: loop header
LB: loop body
LE: loop exit
PB: predicated region body
PF: predicated region fallthrough
CT: control target
= control target key end

     0   :  { %s732_s1 = inlined_call_operand.vmem [shape: bf16[256,128], index: 1, kind: input, shape index: {}]   ;;  %s733_s0 = inlined_call_operand.vmem [shape: bf16[64,256], index: 0, kind: input, shape index: {}]   ;;  %s734_s2 = inlined_call_operand.vmem [shape: f32[1,128], index: 2, kind: input, shape index: {}]   ;;  %s735_s3 = inlined_call_operand.vmem [shape: f32[1,128], index: 3, kind: input, shape index: {}]   ;;  %s736_s4 = inlined_call_operand.vmem [shape: bf16[64,128], index: 4, kind: output, shape index: {}]  }
   0x1   :  { %v555_v0 = vld [vmem:[%s732_s1 + $0x40] sm:$0xff]   ;;  %v557_v2 = vld [vmem:[%s732_s1 + $0x48] sm:$0xff]   ;;  %v559_v4 = vld [vmem:[%s732_s1 + $0x50] sm:$0xff]  }
   0x2   :  { %v556_v1 = vld [vmem:[%s732_s1] sm:$0xff]   ;;  %499 = vmatprep.subr.bf16.mxu0 %v555_v0  ;;  %539 = vmatprep.subr.bf16.mxu1 %v555_v0  ;;  %v558_v3 = vld [vmem:[%s732_s1 + $0x8] sm:$0xff]   ;;  %v560_v5 = vld [vmem:[%s732_s1 + $0x10] sm:$0xff]  }
   0x3   :  { %500 = vmatpush3.bf16.msra.mxu0 %v556_v1  ;;  %547 = vmatpush3.bf16.msra.mxu1 %v556_v1  ;;  %v561_v6 = vld [vmem:[%s732_s1 + $0x58] sm:$0xff]   ;;  %v563_v8 = vld [vmem:[%s732_s1 + $0x60] sm:$0xff]   ;;  %v565_v10 = vld [vmem:[%s732_s1 + $0x68] sm:$0xff]  }
   0x4   :  { %501 = vmatprep.subr.bf16.mxu0 %v557_v2  ;;  %540 = vmatprep.subr.bf16.mxu1 %v557_v2  ;;  %v562_v7 = vld [vmem:[%s732_s1 + $0x18] sm:$0xff]   ;;  %v564_v9 = vld [vmem:[%s732_s1 + $0x20] sm:$0xff]   ;;  %v566_v13 = vld [vmem:[%s732_s1 + $0x28] sm:$0xff]  }
   0x5   :  { %v573_v11 = vld [vmem:[%s733_s0 + $0x4] ss:$8 sps:$4 sm:$0xff]   ;;  %v567_v14 = vld [vmem:[%s732_s1 + $0x70] sm:$0xff]   ;;  %v569_v16 = vld [vmem:[%s732_s1 + $0x78] sm:$0xff]  }
   0x6   :  { %v576_v12 = vld [vmem:[%s733_s0 + $0x24] ss:$8 sps:$4 sm:$0xff]   ;;  %232 = vmatprep.mubr.bf16.mxu0 %v573_v11  ;;  %v568_v15 = vld [vmem:[%s732_s1 + $0x30] sm:$0xff]   ;;  %v570_v17 = vld [vmem:[%s732_s1 + $0x38] sm:$0xff]  }
   0x7   :  { %502 = vmatpush3.bf16.msra.mxu0 %v558_v3  ;;  %548 = vmatpush3.bf16.msra.mxu1 %v558_v3  ;;  %v571_v18 = vld [vmem:[%s733_s0] ss:$8 sps:$4 sm:$0xff]   ;;  %v577_v20 = vld [vmem:[%s733_s0 + $0x14] ss:$8 sps:$4 sm:$0xff]   ;;  %v579_v22 = vld [vmem:[%s733_s0 + $0x10] ss:$8 sps:$4 sm:$0xff]  }
   0x8   :  { %503 = vmatprep.subr.bf16.mxu0 %v559_v4  ;;  %541 = vmatprep.subr.bf16.mxu1 %v559_v4  ;;  %v574_v19 = vld [vmem:[%s733_s0 + $0x20] ss:$8 sps:$4 sm:$0xff]   ;;  %v580_v21 = vld [vmem:[%s733_s0 + $0x34] ss:$8 sps:$4 sm:$0xff]   ;;  %v582_v23 = vld [vmem:[%s733_s0 + $0x30] ss:$8 sps:$4 sm:$0xff]  }
   0x9   :  { %248 = vmatprep.mubr.bf16.mxu1 %v576_v12 }
   0xb   :  { %504 = vmatpush3.bf16.msra.mxu0 %v560_v5  ;;  %549 = vmatpush3.bf16.msra.mxu1 %v560_v5 }
   0xc   :  { %505 = vmatprep.subr.bf16.mxu0 %v561_v6  ;;  %542 = vmatprep.subr.bf16.mxu1 %v561_v6 }
   0xf   :  { %506 = vmatpush3.bf16.msra.mxu0 %v562_v7  ;;  %550 = vmatpush3.bf16.msra.mxu1 %v562_v7 }
  0x10   :  { %507 = vmatprep.subr.bf16.mxu0 %v563_v8  ;;  %543 = vmatprep.subr.bf16.mxu1 %v563_v8 }
  0x13   :  { %508 = vmatpush3.bf16.msra.mxu0 %v564_v9  ;;  %551 = vmatpush3.bf16.msra.mxu1 %v564_v9 }
  0x14   :  { %509 = vmatprep.subr.bf16.mxu0 %v565_v10  ;;  %544 = vmatprep.subr.bf16.mxu1 %v565_v10 }
  0x17   :  { %510 = vmatpush3.bf16.msra.mxu0 %v566_v13  ;;  %552 = vmatpush3.bf16.msra.mxu1 %v566_v13 }
  0x18   :  { %511 = vmatprep.subr.bf16.mxu0 %v567_v14  ;;  %545 = vmatprep.subr.bf16.mxu1 %v567_v14 }
  0x1b   :  { %512 = vmatpush3.bf16.msra.mxu0 %v568_v15  ;;  %553 = vmatpush3.bf16.msra.mxu1 %v568_v15 }
  0x1c   :  { %513 = vmatprep.subr.bf16.mxu0 %v569_v16  ;;  %546 = vmatprep.subr.bf16.mxu1 %v569_v16 }
  0x1f   :  { %514 = vmatpush3.bf16.msra.mxu0 %v570_v17  ;;  %554 = vmatpush3.bf16.msra.mxu1 %v570_v17 }
  0x22   :  { %233 = vmatmul.mubr.bf16.vlgmr.msra.gmra.mrb[0].mxu0 %v571_v18  ;;  %249 = vmatmul.mubr.bf16.vlgmr.msra.gmra.mrb[0].mxu1 %v574_v19 }
  0x23   :  { %240 = vmatprep.mubr.bf16.mxu0 %v577_v20  ;;  %256 = vmatprep.mubr.bf16.mxu1 %v580_v21 }
  0x2a   :  { %241 = vmatmul.mubr.bf16.gmra.mrb[4].mxu0 %v579_v22  ;;  %257 = vmatmul.mubr.bf16.gmra.mrb[4].mxu1 %v582_v23 }
  0xf5   :  { %v515_v24 = vpop.f32.mrb[0].mxu0  ;;  %v527_v25 = vpop.f32.mrb[0].mxu1 }
  0xf6   :  { %v516_v26 = vpop.f32.mrb[1].mxu0  ;;  %v528_v27 = vpop.f32.mrb[1].mxu1 }
  0xf7   :  { %v682_v28 = vadd.f32 %v516_v26, %v515_v24  ;;  %v518_v29 = vpop.f32.mrb[2].mxu0  ;;  %v684_v30 = vadd.f32 %v528_v27, %v527_v25  ;;  %v530_v31 = vpop.f32.mrb[2].mxu1  ;;  %v341_v24 = vlaneseq  ;;  %v325_v26 = vld [vmem:[%s734_s2] sm:$0x1] }
  0xf8   :  { %v519_v32 = vpop.f32.mrb[3].mxu0  ;;  %v531_v33 = vpop.f32.mrb[3].mxu1 }
  0xf9   :  { %v686_v34 = vadd.f32 %v519_v32, %v518_v29  ;;  %v688_v35 = vadd.f32 %v531_v33, %v530_v31  ;;  %v286_v36 = vmul.f32 %v682_v28, %v682_v28  ;;  %v290_v57 = vmul.f32 %v684_v30, %v684_v30  ;;  %v329_v32 = vld [vmem:[%s735_s3] sm:$0x1] }
  0xfa   :  { %v342_v25 = vshrl.u32 %v341_v24, 7 }
  0xfb   :  { %v276_v37 = vadd.f32 %v686_v34, %v682_v28  ;;  %v287_v38 = vmul.f32 %v686_v34, %v686_v34  ;;  %v291_v60 = vmul.f32 %v688_v35, %v688_v35 }
  0xfc   :  { %v343_v27 = vsub.s32 0, %v342_v25 }
  0xfd   :  { %v294_v39 = vadd.f32 %v287_v38, %v286_v36  ;;  %v521_v40 = vpop.f32.mrb[4].mxu0  ;;  %v533_v41 = vpop.f32.mrb[4].mxu1 }
  0xfe   :  { %v522_v42 = vpop.f32.mrb[5].mxu0  ;;  %v534_v43 = vpop.f32.mrb[5].mxu1 }
  0xff   :  { %v523_v44 = vadd.f32 %v522_v42, %v521_v40  ;;  %v524_v45 = vpop.f32.mrb[6].mxu0  ;;  %v535_v46 = vadd.f32 %v534_v43, %v533_v41  ;;  %v536_v47 = vpop.f32.mrb[6].mxu1 }
 0x100   :  { %v525_v48 = vpop.f32.mrb[7].mxu0  ;;  %v537_v49 = vpop.f32.mrb[7].mxu1 }
 0x101   :  { %v277_v50 = vadd.f32 %v523_v44, %v276_v37  ;;  %v288_v51 = vmul.f32 %v523_v44, %v523_v44  ;;  %v526_v52 = vadd.f32 %v525_v48, %v524_v45  ;;  %v538_v53 = vadd.f32 %v537_v49, %v536_v47 }
 0x102   :  { %v292_v63 = vmul.f32 %v535_v46, %v535_v46 }
 0x103   :  { %v295_v54 = vadd.f32 %v294_v39, %v288_v51  ;;  %v278_v55 = vadd.f32 %v526_v52, %v277_v50  ;;  %v289_v56 = vmul.f32 %v526_v52, %v526_v52  ;;  %v293_v4 = vmul.f32 %v538_v53, %v538_v53 }
 0x105   :  { %v279_v58 = vadd.f32 %v684_v30, %v278_v55  ;;  %v296_v59 = vadd.f32 %v295_v54, %v289_v56 }
 0x107   :  { %v297_v61 = vadd.f32 %v296_v59, %v290_v57  ;;  %v280_v62 = vadd.f32 %v688_v35, %v279_v58 }
 0x109   :  { %v281_v0 = vadd.f32 %v535_v46, %v280_v62  ;;  %v298_v1 = vadd.f32 %v297_v61, %v291_v60 }
 0x10b   :  { %v299_v2 = vadd.f32 %v298_v1, %v292_v63  ;;  %v282_v3 = vadd.f32 %v538_v53, %v281_v0 }
 0x10d   :  { %v300_v5 = vadd.f32 %v299_v2, %v293_v4  ;;  %v307_v6 = vrot.slane %v282_v3, 4 }
 0x10f   :  { %v308_v7 = vadd.f32 %v307_v6, %v282_v3  ;;  %v314_v8 = vrot.slane %v300_v5, 4 }
 0x111   :  { %v309_v9 = vrot.slane %v308_v7, 2  ;;  %v315_v10 = vadd.f32 %v314_v8, %v300_v5 }
 0x113   :  { %v310_v11 = vadd.f32 %v309_v9, %v308_v7  ;;  %v316_v12 = vrot.slane %v315_v10, 2 }
 0x115   :  { %v311_v13 = vrot.slane %v310_v11, 1  ;;  %v317_v14 = vadd.f32 %v316_v12, %v315_v10 }
 0x117   :  { %v312_v15 = vadd.f32 %v311_v13, %v310_v11  ;;  %v318_v16 = vrot.slane %v317_v14, 1 }
 0x119   :  { %v319_v17 = vadd.f32 %v318_v16, %v317_v14  ;;  %v320_v18 = vmul.f32 0.02, %v312_v15 }
 0x11b   :  { %v321_v19 = vmul.f32 0.02, %v319_v17  ;;  %v322_v20 = vmul.f32 %v320_v18, %v320_v18 }
 0x11d   :  { %v323_v21 = vsub.f32 %v321_v19, %v322_v20 }
 0x11f   :  { %v324_v22 = vmax.f32 %v323_v21, 0.0 }
 0x121   :  { %v326_v23 = vadd.f32 1e-05, %v324_v22 }
 0x123   :  { %583 = vrsqrt.f32 %v326_v23 }
 0x12d   :  { %v584_v29 = vpop.eup %583 }
 0x12e   :  { %v328_v31 = vmul.f32 %v584_v29, %v325_v26 }
 0x130   :  { %v330_v33 = vmul.f32 %v328_v31, %v320_v18  ;;  %v344_v36 = vrot.slane %v328_v31, %v343_v27 }
 0x132   :  { %v331_v37 = vsub.f32 %v329_v32, %v330_v33  ;;  %v346_v38 = vmul.f32 %v682_v28, %v344_v36  ;;  %v347_v39 = vmul.f32 %v686_v34, %v344_v36  ;;  %v348_v40 = vmul.f32 %v523_v44, %v344_v36 }
 0x133   :  { %v349_v41 = vmul.f32 %v526_v52, %v344_v36  ;;  %v350_v42 = vmul.f32 %v684_v30, %v344_v36  ;;  %v351_v43 = vmul.f32 %v688_v35, %v344_v36  ;;  %v352_v45 = vmul.f32 %v535_v46, %v344_v36 }
 0x134   :  { %v353_v47 = vmul.f32 %v538_v53, %v344_v36  ;;  %v358_v48 = vrot.slane %v331_v37, %v343_v27 }
 0x136   :  { %v360_v49 = vadd.f32 %v358_v48, %v346_v38  ;;  %v361_v50 = vadd.f32 %v358_v48, %v347_v39  ;;  %v362_v51 = vadd.f32 %v358_v48, %v348_v40  ;;  %v363_v54 = vadd.f32 %v358_v48, %v349_v41 }
 0x137   :  { %v364_v55 = vadd.f32 %v358_v48, %v350_v42  ;;  %v365_v56 = vadd.f32 %v358_v48, %v351_v43  ;;  %v366_v57 = vadd.f32 %v358_v48, %v352_v45  ;;  %v367_v58 = vadd.f32 %v358_v48, %v353_v47 }
 0x138   :  { %vm368_vm0 = vcmp.gt.f32.partialorder %v360_v49, 0.0  ;;  %vm369_vm1 = vcmp.gt.f32.partialorder %v361_v50, 0.0  ;;  %vm370_vm2 = vcmp.gt.f32.partialorder %v362_v51, 0.0  ;;  %vm371_vm3 = vcmp.gt.f32.partialorder %v363_v54, 0.0 }
 0x139   :  { %vm372_vm4 = vcmp.gt.f32.partialorder %v364_v55, 0.0  ;;  %vm373_vm5 = vcmp.gt.f32.partialorder %v365_v56, 0.0  ;;  %vm374_vm6 = vcmp.gt.f32.partialorder %v366_v57, 0.0  ;;  %vm375_vm7 = vcmp.gt.f32.partialorder %v367_v58, 0.0 }
 0x13a   :  { %v376_v28 = vmul.f32 0.2, %v360_v49  ;;  %v377_v30 = vmul.f32 0.2, %v361_v50  ;;  %v378_v34 = vmul.f32 0.2, %v362_v51 }
 0x13b   :  { %v379_v35 = vmul.f32 0.2, %v363_v54  ;;  %v380_v44 = vmul.f32 0.2, %v364_v55  ;;  %v381_v46 = vmul.f32 0.2, %v365_v56 }
 0x13c   :  { %v382_v52 = vmul.f32 0.2, %v366_v57  ;;  %v383_v53 = vmul.f32 0.2, %v367_v58  ;;  %v384_v59 = vsel %vm368_vm0, %v360_v49, %v376_v28  ;;  %v385_v60 = vsel %vm369_vm1, %v361_v50, %v377_v30 }
 0x13d   :  { %v386_v61 = vsel %vm370_vm2, %v362_v51, %v378_v34  ;;  %v387_v62 = vsel %vm371_vm3, %v363_v54, %v379_v35  ;;  %v388_v63 = vsel %vm372_vm4, %v364_v55, %v380_v44  ;;  %v389_v0 = vsel %vm373_vm5, %v365_v56, %v381_v46 }
 0x13e   :  { %v390_v1 = vsel %vm374_vm6, %v366_v57, %v382_v52  ;;  %v391_v2 = vsel %vm375_vm7, %v367_v58, %v383_v53  ;;  %v479_v3 = vpack.c.bf16 %v385_v60, %v384_v59  ;;  %v484_v4 = vpack.c.bf16 %v387_v62, %v386_v61 }
 0x13f   :  { %v489_v5 = vpack.c.bf16 %v389_v0, %v388_v63  ;;  %v494_v6 = vpack.c.bf16 %v391_v2, %v390_v1 }
 0x140   :  { %480 = vst [vmem:[%s736_s4] sm:$0xff] %v479_v3   ;;  %496 = vst [vmem:[%s736_s4 + $0x8] sm:$0xff] %v484_v4  }
 0x141   :  { %497 = vst [vmem:[%s736_s4 + $0x10] sm:$0xff] %v489_v5   ;;  %498 = vst [vmem:[%s736_s4 + $0x18] sm:$0xff] %v494_v6  }

// kernel: _lambda_.5
= control target key start
LH: loop header
LB: loop body
LE: loop exit
PB: predicated region body
PF: predicated region fallthrough
CT: control target
= control target key end

     0   :  { %s633_s1 = inlined_call_operand.vmem [shape: bf16[512,128], index: 1, kind: input, shape index: {}]   ;;  %s634_s0 = inlined_call_operand.vmem [shape: bf16[16,512], index: 0, kind: input, shape index: {}]   ;;  %s635_s2 = inlined_call_operand.vmem [shape: f32[16,128], index: 2, kind: output, shape index: {}]  }
   0x1   :  { %v462_v0 = vld [vmem:[%s633_s1 + $0x40] sm:$0xff]   ;;  %v466_v4 = vld [vmem:[%s633_s1 + $0x48] sm:$0xff]   ;;  %v470_v8 = vld [vmem:[%s633_s1 + $0x50] sm:$0xff]  }
   0x2   :  { %v463_v1 = vld [vmem:[%s633_s1 + $0xc0] sm:$0xff]   ;;  %418 = vmatprep.subr.bf16.mxu0 %v462_v0  ;;  %v467_v5 = vld [vmem:[%s633_s1 + $0xc8] sm:$0xff]   ;;  %v471_v9 = vld [vmem:[%s633_s1 + $0xd0] sm:$0xff]  }
   0x3   :  { %v464_v2 = vld [vmem:[%s633_s1] sm:$0xff]   ;;  %440 = vmatprep.subr.bf16.mxu1 %v463_v1  ;;  %v468_v6 = vld [vmem:[%s633_s1 + $0x8] sm:$0xff]   ;;  %v472_v10 = vld [vmem:[%s633_s1 + $0x10] sm:$0xff]  }
   0x4   :  { %v465_v3 = vld [vmem:[%s633_s1 + $0x80] sm:$0xff]   ;;  %419 = vmatpush3.bf16.msra.mxu0 %v464_v2  ;;  %v469_v7 = vld [vmem:[%s633_s1 + $0x88] sm:$0xff]   ;;  %v473_v11 = vld [vmem:[%s633_s1 + $0x90] sm:$0xff]  }
   0x5   :  { %441 = vmatpush3.bf16.msra.mxu1 %v465_v3  ;;  %420 = vmatprep.subr.bf16.mxu0 %v466_v4  ;;  %v474_v12 = vld [vmem:[%s633_s1 + $0x58] sm:$0xff]   ;;  %v478_v16 = vld [vmem:[%s633_s1 + $0x60] sm:$0xff]   ;;  %v482_v20 = vld [vmem:[%s633_s1 + $0x68] sm:$0xff]  }
   0x6   :  { %442 = vmatprep.subr.bf16.mxu1 %v467_v5  ;;  %v475_v13 = vld [vmem:[%s633_s1 + $0xd8] sm:$0xff]   ;;  %v479_v17 = vld [vmem:[%s633_s1 + $0xe0] sm:$0xff]   ;;  %v483_v21 = vld [vmem:[%s633_s1 + $0xe8] sm:$0xff]  }
   0x7   :  { %v476_v14 = vld [vmem:[%s633_s1 + $0x18] sm:$0xff]   ;;  %v480_v18 = vld [vmem:[%s633_s1 + $0x20] sm:$0xff]   ;;  %v484_v22 = vld [vmem:[%s633_s1 + $0x28] sm:$0xff]  }
   0x8   :  { %421 = vmatpush3.bf16.msra.mxu0 %v468_v6  ;;  %v477_v15 = vld [vmem:[%s633_s1 + $0x98] sm:$0xff]   ;;  %v481_v19 = vld [vmem:[%s633_s1 + $0xa0] sm:$0xff]   ;;  %v485_v23 = vld [vmem:[%s633_s1 + $0xa8] sm:$0xff]  }
   0x9   :  { %443 = vmatpush3.bf16.msra.mxu1 %v469_v7  ;;  %422 = vmatprep.subr.bf16.mxu0 %v470_v8  ;;  %v486_v24 = vld [vmem:[%s633_s1 + $0x70] sm:$0xff]   ;;  %v490_v28 = vld [vmem:[%s633_s1 + $0x78] sm:$0xff]  }
   0xa   :  { %444 = vmatprep.subr.bf16.mxu1 %v471_v9  ;;  %v487_v25 = vld [vmem:[%s633_s1 + $0xf0] sm:$0xff]   ;;  %v491_v29 = vld [vmem:[%s633_s1 + $0xf8] sm:$0xff]  }
   0xb   :  { %v488_v26 = vld [vmem:[%s633_s1 + $0x30] sm:$0xff]   ;;  %v492_v30 = vld [vmem:[%s633_s1 + $0x38] sm:$0xff]  }
   0xc   :  { %423 = vmatpush3.bf16.msra.mxu0 %v472_v10  ;;  %v489_v27 = vld [vmem:[%s633_s1 + $0xb0] sm:$0xff]   ;;  %v493_v31 = vld [vmem:[%s633_s1 + $0xb8] sm:$0xff]  }
   0xd   :  { %445 = vmatpush3.bf16.msra.mxu1 %v473_v11  ;;  %424 = vmatprep.subr.bf16.mxu0 %v474_v12  ;;  %v494_v32 = vld [vmem:[%s634_s0] ss:$16 sps:$4 sm:$0xff]   ;;  %v496_v33 = vld [vmem:[%s634_s0 + $0x4] ss:$16 sps:$4 sm:$0xff]   ;;  %v497_v34 = vld [vmem:[%s634_s0 + $0x8] ss:$16 sps:$4 sm:$0xff]  }
   0xe   :  { %446 = vmatprep.subr.bf16.mxu1 %v475_v13  ;;  %v499_v35 = vld [vmem:[%s634_s0 + $0xc] ss:$16 sps:$4 sm:$0xff]   ;;  %324 = vmatprep.mubr.bf16.mxu0 %v496_v33 }
   0xf   :  { %365 = vmatprep.mubr.bf16.mxu1 %v499_v35 }
  0x10   :  { %425 = vmatpush3.bf16.msra.mxu0 %v476_v14 }
  0x11   :  { %447 = vmatpush3.bf16.msra.mxu1 %v477_v15  ;;  %426 = vmatprep.subr.bf16.mxu0 %v478_v16 }
  0x12   :  { %448 = vmatprep.subr.bf16.mxu1 %v479_v17 }
  0x14   :  { %427 = vmatpush3.bf16.msra.mxu0 %v480_v18 }
  0x15   :  { %449 = vmatpush3.bf16.msra.mxu1 %v481_v19  ;;  %428 = vmatprep.subr.bf16.mxu0 %v482_v20 }
  0x16   :  { %450 = vmatprep.subr.bf16.mxu1 %v483_v21 }
  0x18   :  { %429 = vmatpush3.bf16.msra.mxu0 %v484_v22 }
  0x19   :  { %451 = vmatpush3.bf16.msra.mxu1 %v485_v23  ;;  %430 = vmatprep.subr.bf16.mxu0 %v486_v24 }
  0x1a   :  { %452 = vmatprep.subr.bf16.mxu1 %v487_v25 }
  0x1c   :  { %431 = vmatpush3.bf16.msra.mxu0 %v488_v26 }
  0x1d   :  { %453 = vmatpush3.bf16.msra.mxu1 %v489_v27  ;;  %432 = vmatprep.subr.bf16.mxu0 %v490_v28 }
  0x1e   :  { %454 = vmatprep.subr.bf16.mxu1 %v491_v29 }
  0x20   :  { %433 = vmatpush3.bf16.msra.mxu0 %v492_v30 }
  0x21   :  { %455 = vmatpush3.bf16.msra.mxu1 %v493_v31 }
  0x23   :  { %325 = vmatmul.mubr.bf16.vlgmr.msra.gmra.mrb[0].mxu0 %v494_v32 }
  0x24   :  { %366 = vmatmul.mubr.bf16.vlgmr.msra.gmra.mrb[0].mxu1 %v497_v34 }
  0xf6   :  { %v434_v36 = vpop.f32.mrb[0].mxu0 }
  0xf7   :  { %v456_v37 = vpop.f32.mrb[0].mxu1  ;;  %v435_v38 = vpop.f32.mrb[1].mxu0 }
  0xf8   :  { %v436_v39 = vadd.f32 %v435_v38, %v434_v36  ;;  %v457_v40 = vpop.f32.mrb[1].mxu1  ;;  %v437_v41 = vpop.f32.mrb[2].mxu0 }
  0xf9   :  { %v458_v42 = vadd.f32 %v457_v40, %v456_v37  ;;  %v459_v43 = vpop.f32.mrb[2].mxu1  ;;  %v438_v44 = vpop.f32.mrb[3].mxu0 }
  0xfa   :  { %v439_v45 = vadd.f32 %v438_v44, %v437_v41  ;;  %v460_v46 = vpop.f32.mrb[3].mxu1 }
  0xfb   :  { %v368_v47 = vadd.f32 %v458_v42, %v436_v39  ;;  %v461_v48 = vadd.f32 %v460_v46, %v459_v43 }
  0xfd   :  { %500 = vtanh.f32 %v368_v47  ;;  %v371_v49 = vadd.f32 %v461_v48, %v439_v45 }
  0xff   :  { %502 = vtanh.f32 %v371_v49 }
 0x107   :  { %v501_v50 = vpop.eup %500 }
 0x108   :  { %376 = vst [vmem:[%s635_s2] sm:$0xff] %v501_v50 }
 0x109   :  { %v503_v51 = vpop.eup %502 }
 0x10a   :  { %377 = vst [vmem:[%s635_s2 + $0x8] sm:$0xff] %v503_v51 }

</bundles_post_ra>
